<compile_context>
chip_gen: v7x
topology: tpu7x:2x2x1
jax: 0.10.0
libtpu: 0.0.40
codegen_flags: <defaults>
</compile_context>

<pallas_src>
import jax
import jax.numpy as jnp
from jax.experimental import pallas as pl
from jax.experimental.pallas import tpu as pltpu


def _round_up(v, m):
    return ((v + m - 1) // m) * m


def _encoder_latent_kernel(px_ref, c_ref, wpx_ref, wc_ref, ws_ref, bs_ref, out_ref):
    f32 = jnp.float32
    cdt = wpx_ref.dtype                      # matmul operand dtype (f32 or bf16)

    K = px_ref.shape[1]                      # dim + 1
    H = wc_ref.shape[1]                      # hidden width (128)
    BB = c_ref.shape[0]                      # batch block
    M = px_ref.shape[0]                      # BB * T
    T = M // BB
    zd2 = ws_ref.shape[1] - 5 * H            # 2 * z_dim
    zd = zd2 // 2

    # ---- weight / bias slab slices (all 128-lane aligned, static) ----
    w1 = ws_ref[:, 0 * H:1 * H]
    w2a = ws_ref[:, 1 * H:2 * H]
    w2b = ws_ref[:, 2 * H:3 * H]
    w3a = ws_ref[:, 3 * H:4 * H]
    w3b = ws_ref[:, 4 * H:5 * H]
    wml = ws_ref[:, 5 * H:5 * H + zd2]
    b_in = bs_ref[:, 0 * H:1 * H]            # b0 + bpos + bc (fused)
    b1 = bs_ref[:, 1 * H:2 * H]
    b2 = bs_ref[:, 2 * H:3 * H]
    b3 = bs_ref[:, 3 * H:4 * H]
    bml = bs_ref[:, 4 * H:4 * H + zd2]

    # ---- fc_0(x) + fc_pos(p): one MXU pass over the (M, dim+1) point features ----
    net = jnp.dot(px_ref[...], wpx_ref[...], preferred_element_type=f32) + b_in    # (M, H)

    # ---- fc_c(c): one (BB, c_dim) @ (c_dim, H) matmul per block, broadcast over T ----
    cw = jnp.dot(c_ref[...], wc_ref[...], preferred_element_type=f32)              # (BB, H)
    net = net.reshape(BB, T, H) + cw[:, None, :]

    # ---- fc_1(relu(net)) ----
    r0 = jnp.maximum(net, 0.0).reshape(M, H)
    h1 = jnp.dot(r0.astype(cdt), w1, preferred_element_type=f32) + b1              # (M, H)

    # ---- pool / skip / fc_2  (concat replaced by split weights; relu reused) ----
    r1 = jnp.maximum(h1, 0.0)                                                      # relu(h1)
    pool1 = jnp.max(r1.reshape(BB, T, H), axis=1)                                  # == relu(max(h1))
    a2 = jnp.dot(r1.astype(cdt), w2a, preferred_element_type=f32)                  # (M, H)
    p2 = jnp.dot(pool1.astype(cdt), w2b, preferred_element_type=f32) + b2          # (BB, H)
    h2 = a2.reshape(BB, T, H) + p2[:, None, :]

    # ---- pool / skip / fc_3 ----
    r2 = jnp.maximum(h2, 0.0)
    pool2 = jnp.max(r2, axis=1)                                                    # (BB, H)
    a3 = jnp.dot(r2.reshape(M, H).astype(cdt), w3a, preferred_element_type=f32)
    p3 = jnp.dot(pool2.astype(cdt), w3b, preferred_element_type=f32) + b3
    h3 = a3.reshape(BB, T, H) + p3[:, None, :]

    # ---- final pool (no relu) + fused mean|logstd head ----
    pool3 = jnp.max(h3, axis=1)                                                    # (BB, H)
    out = jnp.dot(pool3.astype(cdt), wml, preferred_element_type=f32) + bml        # (BB, 2*zd)
    mean = out[:, :zd]
    logstd = out[:, zd:]
    std = jnp.maximum(logstd, 0.0) + jnp.log1p(jnp.exp(-jnp.abs(logstd)))          # softplus

    out_ref[:, 0:zd] = mean
    out_ref[:, zd:zd2] = std


def encoder_latent_forward(p, x, c, params, *, z_dim=128, block_batch=128, use_bf16=False):
    """p: (B, T, dim), x: (B, T), c: (B, c_dim) -> (mean, std) each (B, z_dim)."""
    B, T, dim = p.shape
    c_dim = c.shape[-1]
    H = params["w1"].shape[0]                 # hidden width (128)
    K = dim + 1
    f32 = jnp.float32
    cdt = jnp.bfloat16 if use_bf16 else f32   # MXU operand dtype

    # ---- wrapper-level weight algebra (fusions / splits / slab packing) ----
    wpx = jnp.concatenate([params["wpos"], params["w0"]], axis=0).astype(cdt)      # (K, H)
    wc = params["wc"].astype(cdt)                                                  # (c_dim, H)
    w2a, w2b = params["w2"][:H], params["w2"][H:]
    w3a, w3b = params["w3"][:H], params["w3"][H:]
    wml = jnp.concatenate([params["wm"], params["wl"]], axis=1)                    # (H, 2*z_dim)
    slab_w = jnp.concatenate([params["w1"], w2a, w2b, w3a, w3b, wml],
                             axis=1).astype(cdt)                                   # (H, 5H+2z)
    b_in = params["b0"] + params["bpos"] + params["bc"]
    bml = jnp.concatenate([params["bm"], params["bl"]])
    slab_b = jnp.concatenate([b_in, params["b1"], params["b2"], params["b3"],
                              bml]).reshape(1, -1).astype(f32)                     # (1, 4H+2z)

    # ---- batch blocking: pad to 8, guarantee >=2 grid steps when B > 8, cap by VMEM ----
    B8 = _round_up(max(B, 1), 8)
    if B8 <= 8:
        BB = 8
    else:
        BB = min(block_batch, _round_up(pl.cdiv(B8, 2), 8))
    # Keep a handful of (BB*T, H) f32 intermediates well within VMEM (sized for v7x 64 MiB).
    bb_cap = max(8, ((24 * 1024 * 1024) // (6 * T * H * 4)) // 8 * 8)
    BB = max(8, min(BB, bb_cap))
    B_pad = _round_up(B8, BB)

    # ---- inputs: dense 2-D layouts (contiguous per-block DMA) ----
    px = jnp.concatenate([p.astype(f32), x.astype(f32)[..., None]], axis=-1)       # (B, T, K)
    c = c.astype(f32)
    if B_pad != B:
        px = jnp.pad(px, ((0, B_pad - B), (0, 0), (0, 0)))
        c = jnp.pad(c, ((0, B_pad - B), (0, 0)))
    px2d = px.reshape(B_pad * T, K).astype(cdt)                                    # (B_pad*T, K)
    c2d = c.astype(cdt)                                                            # (B_pad, c_dim)

    def const_spec(a):
        return pl.BlockSpec(a.shape, lambda i: (0,) * a.ndim)

    out = pl.pallas_call(
        _encoder_latent_kernel,
        grid=(B_pad // BB,),
        in_specs=[
            pl.BlockSpec((BB * T, K), lambda i: (i, 0)),
            pl.BlockSpec((BB, c_dim), lambda i: (i, 0)),
            const_spec(wpx), const_spec(wc), const_spec(slab_w), const_spec(slab_b),
        ],
        out_specs=pl.BlockSpec((BB, 2 * z_dim), lambda i: (i, 0)),
        out_shape=jax.ShapeDtypeStruct((B_pad, 2 * z_dim), f32),
        compiler_params=pltpu.CompilerParams(
            # batch blocks are independent -> megacore-shardable on v7x
            dimension_semantics=("parallel",),
            vmem_limit_bytes=48 * 1024 * 1024,
        ),
    )(px2d, c2d, wpx, wc, slab_w, slab_b)

    return out[:B, :z_dim], out[:B, z_dim:]


def init_params(key, dim=3, c_dim=128, z_dim=128):
    """Deterministic synthetic init (matches PyTorch Linear fan-in uniform scheme)."""
    names_shapes = [
        ("w0", 1, 128), ("wpos", dim, 128), ("wc", c_dim, 128),
        ("w1", 128, 128), ("w2", 256, 128), ("w3", 256, 128),
        ("wm", 128, z_dim), ("wl", 128, z_dim),
    ]
    params = {}
    keys = jax.random.split(key, len(names_shapes))
    for k, (name, fan_in, fan_out) in zip(keys, names_shapes):
        kw, kb = jax.random.split(k)
        bound = 1.0 / (fan_in ** 0.5)
        params[name] = jax.random.uniform(kw, (fan_in, fan_out), jnp.float32, -bound, bound)
        params["b" + name[1:]] = jax.random.uniform(kb, (fan_out,), jnp.float32, -bound, bound)
    return params


def reference_forward(p, x, c, params):
    """Pure-JAX reference mirroring the PyTorch module (leaky=False path)."""
    net = x[..., None] @ params["w0"] + params["b0"]
    net = net + p @ params["wpos"] + params["bpos"]
    net = net + (c @ params["wc"] + params["bc"])[:, None, :]
    net = jnp.maximum(net, 0.0) @ params["w1"] + params["b1"]
    pooled = jnp.max(net, axis=1, keepdims=True)
    net = jnp.concatenate([net, jnp.broadcast_to(pooled, net.shape)], axis=2)
    net = jnp.maximum(net, 0.0) @ params["w2"] + params["b2"]
    pooled = jnp.max(net, axis=1, keepdims=True)
    net = jnp.concatenate([net, jnp.broadcast_to(pooled, net.shape)], axis=2)
    net = jnp.maximum(net, 0.0) @ params["w3"] + params["b3"]
    net = jnp.max(net, axis=1)
    mean = net @ params["wm"] + params["bm"]
    std = jax.nn.softplus(net @ params["wl"] + params["bl"])
    return mean, std


if __name__ == "__main__":
    DIM, C_DIM, Z_DIM, T = 3, 128, 128, 8

    key = jax.random.PRNGKey(0)
    kparams, kdata = jax.random.split(key)
    params = init_params(kparams, dim=DIM, c_dim=C_DIM, z_dim=Z_DIM)

    def make_inputs(B):
        kp, kx, kc = jax.random.split(jax.random.fold_in(kdata, B), 3)
        p = jax.random.normal(kp, (B, T, DIM), jnp.float32)
        x = jax.random.normal(kx, (B, T), jnp.float32)
        c = jax.random.normal(kc, (B, C_DIM), jnp.float32)
        return p, x, c

    # f32 path: tight tolerance.  Cases exercise single-block with batch padding,
    # multi-step grid with small BB, and the >=2-block v7x megacore path.
    for B, bb in [(2, 128), (20, 8), (20, 128)]:
        p, x, c = make_inputs(B)
        mean, std = encoder_latent_forward(p, x, c, params, z_dim=Z_DIM, block_batch=bb)
        mean, std = jax.block_until_ready((mean, std))
        mean_ref, std_ref = reference_forward(p, x, c, params)
        assert mean.shape == (B, Z_DIM) and std.shape == (B, Z_DIM)
        assert jnp.allclose(mean, mean_ref, atol=1e-4, rtol=1e-4), \
            float(jnp.max(jnp.abs(mean - mean_ref)))
        assert jnp.allclose(std, std_ref, atol=1e-4, rtol=1e-4), \
            float(jnp.max(jnp.abs(std - std_ref)))

    # bf16 MXU-operand path (v6e/v7x recommendation): loose tolerance sanity check.
    B = 20
    p, x, c = make_inputs(B)
    mean_bf, std_bf = encoder_latent_forward(p, x, c, params, z_dim=Z_DIM,
                                             block_batch=128, use_bf16=True)
    mean_bf, std_bf = jax.block_until_ready((mean_bf, std_bf))
    mean_ref, std_ref = reference_forward(p, x, c, params)
    assert mean_bf.shape == (B, Z_DIM) and std_bf.shape == (B, Z_DIM)
    assert bool(jnp.all(jnp.isfinite(mean_bf))) and bool(jnp.all(jnp.isfinite(std_bf)))
    assert float(jnp.max(jnp.abs(mean_bf - mean_ref))) < 0.2
    assert float(jnp.max(jnp.abs(std_bf - std_ref))) < 0.2

    print("KERNEL_OK")
</pallas_src>

<mosaic_0001>
module attributes {stable_mosaic.version = 11 : i64} {
  func.func @_encoder_latent_kernel(%arg0: i32, %arg1: memref<64x4xf32, #tpu.memory_space<vmem>>, %arg2: memref<8x128xf32, #tpu.memory_space<vmem>>, %arg3: memref<4x128xf32, #tpu.memory_space<vmem>>, %arg4: memref<128x128xf32, #tpu.memory_space<vmem>>, %arg5: memref<128x896xf32, #tpu.memory_space<vmem>>, %arg6: memref<1x768xf32, #tpu.memory_space<vmem>>, %arg7: memref<8x256xf32, #tpu.memory_space<vmem>>) attributes {dimension_semantics = [#tpu.dimension_semantics<parallel>], iteration_bounds = array<i64: 1>, scalar_prefetch = 0 : i64, scratch_operands = 0 : i64, tpu.core_type = #tpu.core_type<tc>, window_params = [{transform_indices = @transform_0, window_bounds = array<i64: 64, 4>}, {transform_indices = @transform_1, window_bounds = array<i64: 8, 128>}, {pipeline_mode = #tpu.pipeline_mode<synchronous>, transform_indices = @transform_2, window_bounds = array<i64: 4, 128>}, {pipeline_mode = #tpu.pipeline_mode<synchronous>, transform_indices = @transform_3, window_bounds = array<i64: 128, 128>}, {pipeline_mode = #tpu.pipeline_mode<synchronous>, transform_indices = @transform_4, window_bounds = array<i64: 128, 896>}, {pipeline_mode = #tpu.pipeline_mode<synchronous>, transform_indices = @transform_5, window_bounds = array<i64: 1, 768>}, {transform_indices = @transform_6, window_bounds = array<i64: 8, 256>}]} {
    %c0 = arith.constant 0 : index
    %c0_0 = arith.constant 0 : index
    %0 = vector.load %arg5[%c0, %c0_0] : memref<128x896xf32, #tpu.memory_space<vmem>>, vector<128x128xf32>
    %c0_1 = arith.constant 0 : index
    %c128 = arith.constant 128 : index
    %1 = vector.load %arg5[%c0_1, %c128] : memref<128x896xf32, #tpu.memory_space<vmem>>, vector<128x128xf32>
    %c0_2 = arith.constant 0 : index
    %c256 = arith.constant 256 : index
    %2 = vector.load %arg5[%c0_2, %c256] : memref<128x896xf32, #tpu.memory_space<vmem>>, vector<128x128xf32>
    %c0_3 = arith.constant 0 : index
    %c384 = arith.constant 384 : index
    %3 = vector.load %arg5[%c0_3, %c384] : memref<128x896xf32, #tpu.memory_space<vmem>>, vector<128x128xf32>
    %c0_4 = arith.constant 0 : index
    %c512 = arith.constant 512 : index
    %4 = vector.load %arg5[%c0_4, %c512] : memref<128x896xf32, #tpu.memory_space<vmem>>, vector<128x128xf32>
    %c0_5 = arith.constant 0 : index
    %c640 = arith.constant 640 : index
    %5 = vector.load %arg5[%c0_5, %c640] : memref<128x896xf32, #tpu.memory_space<vmem>>, vector<128x256xf32>
    %c0_6 = arith.constant 0 : index
    %c0_7 = arith.constant 0 : index
    %6 = vector.load %arg6[%c0_6, %c0_7] : memref<1x768xf32, #tpu.memory_space<vmem>>, vector<1x128xf32>
    %c0_8 = arith.constant 0 : index
    %c128_9 = arith.constant 128 : index
    %7 = vector.load %arg6[%c0_8, %c128_9] : memref<1x768xf32, #tpu.memory_space<vmem>>, vector<1x128xf32>
    %c0_10 = arith.constant 0 : index
    %c256_11 = arith.constant 256 : index
    %8 = vector.load %arg6[%c0_10, %c256_11] : memref<1x768xf32, #tpu.memory_space<vmem>>, vector<1x128xf32>
    %c0_12 = arith.constant 0 : index
    %c384_13 = arith.constant 384 : index
    %9 = vector.load %arg6[%c0_12, %c384_13] : memref<1x768xf32, #tpu.memory_space<vmem>>, vector<1x128xf32>
    %c0_14 = arith.constant 0 : index
    %c512_15 = arith.constant 512 : index
    %10 = vector.load %arg6[%c0_14, %c512_15] : memref<1x768xf32, #tpu.memory_space<vmem>>, vector<1x256xf32>
    %c0_16 = arith.constant 0 : index
    %c0_17 = arith.constant 0 : index
    %11 = vector.load %arg1[%c0_16, %c0_17] : memref<64x4xf32, #tpu.memory_space<vmem>>, vector<64x4xf32>
    %c0_18 = arith.constant 0 : index
    %c0_19 = arith.constant 0 : index
    %12 = vector.load %arg3[%c0_18, %c0_19] : memref<4x128xf32, #tpu.memory_space<vmem>>, vector<4x128xf32>
    %cst = arith.constant dense<0.000000e+00> : vector<64x128xf32>
    %13 = tpu.matmul %11, %12, %cst {dimension_numbers = #tpu.dot_dimension_numbers<[1], [0], [0], [1], [0, 0, 1, 1], [], []>} : vector<64x4xf32>, vector<4x128xf32>, vector<64x128xf32> -> vector<64x128xf32>
    %14 = vector.broadcast %6 : vector<1x128xf32> to vector<64x128xf32>
    %15 = arith.addf %13, %14 : vector<64x128xf32>
    %c0_20 = arith.constant 0 : index
    %c0_21 = arith.constant 0 : index
    %16 = vector.load %arg2[%c0_20, %c0_21] : memref<8x128xf32, #tpu.memory_space<vmem>>, vector<8x128xf32>
    %c0_22 = arith.constant 0 : index
    %c0_23 = arith.constant 0 : index
    %17 = vector.load %arg4[%c0_22, %c0_23] : memref<128x128xf32, #tpu.memory_space<vmem>>, vector<128x128xf32>
    %cst_24 = arith.constant dense<0.000000e+00> : vector<8x128xf32>
    %18 = tpu.matmul %16, %17, %cst_24 {dimension_numbers = #tpu.dot_dimension_numbers<[1], [0], [0], [1], [0, 0, 1, 1], [], []>} : vector<8x128xf32>, vector<128x128xf32>, vector<8x128xf32> -> vector<8x128xf32>
    %19 = vector.shape_cast %15 : vector<64x128xf32> to vector<8x8x128xf32>
    %20 = vector.shape_cast %18 : vector<8x128xf32> to vector<8x1x128xf32>
    %21 = vector.broadcast %20 : vector<8x1x128xf32> to vector<8x8x128xf32>
    %22 = arith.addf %19, %21 : vector<8x8x128xf32>
    %cst_25 = arith.constant 0.000000e+00 : f32
    %23 = vector.broadcast %cst_25 : f32 to vector<8x8x128xf32>
    %24 = arith.maximumf %22, %23 : vector<8x8x128xf32>
    %25 = vector.shape_cast %24 : vector<8x8x128xf32> to vector<64x128xf32>
    %cst_26 = arith.constant dense<0.000000e+00> : vector<64x128xf32>
    %26 = tpu.matmul %25, %0, %cst_26 {dimension_numbers = #tpu.dot_dimension_numbers<[1], [0], [0], [1], [0, 0, 1, 1], [], []>} : vector<64x128xf32>, vector<128x128xf32>, vector<64x128xf32> -> vector<64x128xf32>
    %27 = vector.broadcast %7 : vector<1x128xf32> to vector<64x128xf32>
    %28 = arith.addf %26, %27 : vector<64x128xf32>
    %cst_27 = arith.constant 0.000000e+00 : f32
    %29 = vector.broadcast %cst_27 : f32 to vector<64x128xf32>
    %30 = arith.maximumf %28, %29 : vector<64x128xf32>
    %31 = vector.shape_cast %30 : vector<64x128xf32> to vector<8x8x128xf32>
    %cst_28 = arith.constant dense<0xFF800000> : vector<8x128xf32>
    %32 = vector.multi_reduction <maximumf>, %31, %cst_28 [1] : vector<8x8x128xf32> to vector<8x128xf32>
    %cst_29 = arith.constant dense<0.000000e+00> : vector<64x128xf32>
    %33 = tpu.matmul %30, %1, %cst_29 {dimension_numbers = #tpu.dot_dimension_numbers<[1], [0], [0], [1], [0, 0, 1, 1], [], []>} : vector<64x128xf32>, vector<128x128xf32>, vector<64x128xf32> -> vector<64x128xf32>
    %cst_30 = arith.constant dense<0.000000e+00> : vector<8x128xf32>
    %34 = tpu.matmul %32, %2, %cst_30 {dimension_numbers = #tpu.dot_dimension_numbers<[1], [0], [0], [1], [0, 0, 1, 1], [], []>} : vector<8x128xf32>, vector<128x128xf32>, vector<8x128xf32> -> vector<8x128xf32>
    %35 = vector.broadcast %8 : vector<1x128xf32> to vector<8x128xf32>
    %36 = arith.addf %34, %35 : vector<8x128xf32>
    %37 = vector.shape_cast %33 : vector<64x128xf32> to vector<8x8x128xf32>
    %38 = vector.shape_cast %36 : vector<8x128xf32> to vector<8x1x128xf32>
    %39 = vector.broadcast %38 : vector<8x1x128xf32> to vector<8x8x128xf32>
    %40 = arith.addf %37, %39 : vector<8x8x128xf32>
    %cst_31 = arith.constant 0.000000e+00 : f32
    %41 = vector.broadcast %cst_31 : f32 to vector<8x8x128xf32>
    %42 = arith.maximumf %40, %41 : vector<8x8x128xf32>
    %cst_32 = arith.constant dense<0xFF800000> : vector<8x128xf32>
    %43 = vector.multi_reduction <maximumf>, %42, %cst_32 [1] : vector<8x8x128xf32> to vector<8x128xf32>
    %44 = vector.shape_cast %42 : vector<8x8x128xf32> to vector<64x128xf32>
    %cst_33 = arith.constant dense<0.000000e+00> : vector<64x128xf32>
    %45 = tpu.matmul %44, %3, %cst_33 {dimension_numbers = #tpu.dot_dimension_numbers<[1], [0], [0], [1], [0, 0, 1, 1], [], []>} : vector<64x128xf32>, vector<128x128xf32>, vector<64x128xf32> -> vector<64x128xf32>
    %cst_34 = arith.constant dense<0.000000e+00> : vector<8x128xf32>
    %46 = tpu.matmul %43, %4, %cst_34 {dimension_numbers = #tpu.dot_dimension_numbers<[1], [0], [0], [1], [0, 0, 1, 1], [], []>} : vector<8x128xf32>, vector<128x128xf32>, vector<8x128xf32> -> vector<8x128xf32>
    %47 = vector.broadcast %9 : vector<1x128xf32> to vector<8x128xf32>
    %48 = arith.addf %46, %47 : vector<8x128xf32>
    %49 = vector.shape_cast %45 : vector<64x128xf32> to vector<8x8x128xf32>
    %50 = vector.shape_cast %48 : vector<8x128xf32> to vector<8x1x128xf32>
    %51 = vector.broadcast %50 : vector<8x1x128xf32> to vector<8x8x128xf32>
    %52 = arith.addf %49, %51 : vector<8x8x128xf32>
    %cst_35 = arith.constant dense<0xFF800000> : vector<8x128xf32>
    %53 = vector.multi_reduction <maximumf>, %52, %cst_35 [1] : vector<8x8x128xf32> to vector<8x128xf32>
    %cst_36 = arith.constant dense<0.000000e+00> : vector<8x256xf32>
    %54 = tpu.matmul %53, %5, %cst_36 {dimension_numbers = #tpu.dot_dimension_numbers<[1], [0], [0], [1], [0, 0, 1, 1], [], []>} : vector<8x128xf32>, vector<128x256xf32>, vector<8x256xf32> -> vector<8x256xf32>
    %55 = vector.broadcast %10 : vector<1x256xf32> to vector<8x256xf32>
    %56 = arith.addf %54, %55 : vector<8x256xf32>
    %57 = vector.extract_strided_slice %56 {offsets = [0, 0], sizes = [8, 128], strides = [1, 1]} : vector<8x256xf32> to vector<8x128xf32>
    %58 = vector.extract_strided_slice %56 {offsets = [0, 128], sizes = [8, 128], strides = [1, 1]} : vector<8x256xf32> to vector<8x128xf32>
    %cst_37 = arith.constant 0.000000e+00 : f32
    %59 = vector.broadcast %cst_37 : f32 to vector<8x128xf32>
    %60 = arith.maximumf %58, %59 : vector<8x128xf32>
    %61 = math.absf %58 : vector<8x128xf32>
    %cst_38 = arith.constant 0.000000e+00 : f32
    %62 = vector.broadcast %cst_38 : f32 to vector<8x128xf32>
    %63 = arith.subf %62, %61 : vector<8x128xf32>
    %64 = math.exp %63 : vector<8x128xf32>
    %65 = math.log1p %64 : vector<8x128xf32>
    %66 = arith.addf %60, %65 : vector<8x128xf32>
    %c0_39 = arith.constant 0 : index
    %c0_40 = arith.constant 0 : index
    %67 = vector.load %arg7[%c0_39, %c0_40] : memref<8x256xf32, #tpu.memory_space<vmem>>, vector<8x128xf32>
    tpu.vector_store %arg7[%c0_39, %c0_40], %57 {strides = array<i32>} : memref<8x256xf32, #tpu.memory_space<vmem>>, vector<8x128xf32>,
    %c0_41 = arith.constant 0 : index
    %c128_42 = arith.constant 128 : index
    %68 = vector.load %arg7[%c0_41, %c128_42] : memref<8x256xf32, #tpu.memory_space<vmem>>, vector<8x128xf32>
    tpu.vector_store %arg7[%c0_41, %c128_42], %66 {strides = array<i32>} : memref<8x256xf32, #tpu.memory_space<vmem>>, vector<8x128xf32>,
    return
  }
  func.func @transform_0(%arg0: i32) -> (i32, i32) {
    %c0_i32 = arith.constant 0 : i32
    %c0_i32_0 = arith.constant 0 : i32
    return %arg0, %c0_i32 : i32, i32
  }
  func.func @transform_1(%arg0: i32) -> (i32, i32) {
    %c0_i32 = arith.constant 0 : i32
    %c0_i32_0 = arith.constant 0 : i32
    return %arg0, %c0_i32 : i32, i32
  }
  func.func @transform_2(%arg0: i32) -> (i32, i32) {
    %c0_i32 = arith.constant 0 : i32
    %c0_i32_0 = arith.constant 0 : i32
    %c0_i32_1 = arith.constant 0 : i32
    return %c0_i32, %c0_i32_0 : i32, i32
  }
  func.func @transform_3(%arg0: i32) -> (i32, i32) {
    %c0_i32 = arith.constant 0 : i32
    %c0_i32_0 = arith.constant 0 : i32
    %c0_i32_1 = arith.constant 0 : i32
    return %c0_i32, %c0_i32_0 : i32, i32
  }
  func.func @transform_4(%arg0: i32) -> (i32, i32) {
    %c0_i32 = arith.constant 0 : i32
    %c0_i32_0 = arith.constant 0 : i32
    %c0_i32_1 = arith.constant 0 : i32
    return %c0_i32, %c0_i32_0 : i32, i32
  }
  func.func @transform_5(%arg0: i32) -> (i32, i32) {
    %c0_i32 = arith.constant 0 : i32
    %c0_i32_0 = arith.constant 0 : i32
    %c0_i32_1 = arith.constant 0 : i32
    return %c0_i32, %c0_i32_0 : i32, i32
  }
  func.func @transform_6(%arg0: i32) -> (i32, i32) {
    %c0_i32 = arith.constant 0 : i32
    %c0_i32_0 = arith.constant 0 : i32
    return %arg0, %c0_i32 : i32, i32
  }
}

</mosaic_0001>

<bundles_post_ra>
// kernel: tpu_custom_call.1
= control target key start
LH: loop header
LB: loop body
LE: loop exit
PB: predicated region body
PF: predicated region fallthrough
CT: control target
= control target key end

     0   :  { %11 = vsyncpa [#allocation3], 0  ;;  %s2432_s0 = inlined_call_operand.vmem [shape: f32[64,4], index: 0, kind: input, shape index: {}]   ;;  %s2433_s1 = inlined_call_operand.vmem [shape: f32[8,128], index: 1, kind: input, shape index: {}]   ;;  %s2434_s2 = inlined_call_operand.vmem [shape: f32[4,128], index: 2, kind: input, shape index: {}]   ;;  %s2435_s3 = inlined_call_operand.hbm [shape: f32[128,128], index: 3, kind: input, shape index: {}]   ;;  %s2436_s4 = inlined_call_operand.hbm [shape: f32[128,896], index: 4, kind: input, shape index: {}]   ;;  %s2437_s5 = inlined_call_operand.vmem [shape: f32[1,768], index: 5, kind: input, shape index: {}]   ;;  %s2438_s6 = inlined_call_operand.hbm [shape: f32[8,256], index: 6, kind: output, shape index: {}]  }
   0x1   :  { %12 = vsyncpa [#allocation6], 0 }
   0x2   :  { %13 = vsyncpa [#allocation4], 0  ;;  %s2193_s21 = smov [#allocation2]   ;;  %s2121_s25 = scalar_lea.hbm %s2435_s3, 2048 }
   0x3   :  { %s25_s22 = sshll.u32 %s2193_s21, 4  ;;  %p2122_p0 = scmp.ne.s32.totalorder %s2435_s3, %s2121_s25  ;;  %s26_s22 = int_to_ptr.vmem [resolvable:$true] %s25_s22 }
   0x4   :  { %p2125_p1 = scmp.lt.u32.totalorder %s2121_s25, %s2435_s3 }
   0x6   :  { %p2127_p2 = pnand %p2125_p1, %p2122_p0 }
   0x8   :  { %2130 = shalt.err (!%p2127_p2)
}
   0x9   :  { %s2131_s30 = scalar_lea.vmem %s26_s22, 2048  ;;  %p2136_p4 = scmp.lt.s32.totalorder %s26_s22, %s26_s22 }
   0xa   :  { %p2132_p3 = scmp.ne.s32.totalorder %s26_s22, %s2131_s30  ;;  %p2137_p5 = scmp.lt.s32.totalorder %s2131_s30, %s2131_s30 }
   0xc   :  { %p2138_p6 = por %p2137_p5, %p2136_p4 }
   0xe   :  { %p2139_p7 = pnand %p2138_p6, %p2132_p3 }
  0x10   :  { %2142 = shalt.err (!%p2139_p7)
}
  0x11   :  { %s2194_s7 = smov 128   ;;  %s2195_s8 = smov 8  }
  0x12   :  { %31 = dma.hbm_to_vmem [thread:$0]  %s2435_s3, 2048, %s26_s22, [#allocation3], %s2194_s7, %s2194_s7, %s2195_s8  }
  0x13   :  { %s2196_s11 = smov [#allocation5]   ;;  %s2143_s15 = scalar_lea.hbm %s2436_s4, 14336 }
  0x14   :  { %s37_s12 = sshll.u32 %s2196_s11, 4  ;;  %p2144_p8 = scmp.ne.s32.totalorder %s2436_s4, %s2143_s15  ;;  %s38_s12 = int_to_ptr.vmem [resolvable:$true] %s37_s12 }
  0x15   :  { %p2147_p9 = scmp.lt.u32.totalorder %s2143_s15, %s2436_s4 }
  0x17   :  { %p2149_p10 = pnand %p2147_p9, %p2144_p8 }
  0x19   :  { %2152 = shalt.err (!%p2149_p10)
}
  0x1a   :  { %s2153_s20 = scalar_lea.vmem %s38_s12, 14336  ;;  %p2158_p12 = scmp.lt.s32.totalorder %s38_s12, %s38_s12 }
  0x1b   :  { %p2154_p11 = scmp.ne.s32.totalorder %s38_s12, %s2153_s20  ;;  %p2159_p13 = scmp.lt.s32.totalorder %s2153_s20, %s2153_s20 }
  0x1d   :  { %p2160_p0 = por %p2159_p13, %p2158_p12 }
  0x1f   :  { %p2161_p1 = pnand %p2160_p0, %p2154_p11 }
  0x21   :  { %2164 = shalt.err (!%p2161_p1)
}
  0x22   :  { %s2197_s3 = smov 896   ;;  %s2198_s21 = smov 56  }
  0x23   :  { %43 = dma.hbm_to_vmem [thread:$0]  %s2436_s4, 14336, %s38_s12, [#allocation6], %s2197_s3, %s2197_s3, %s2198_s21  }
  0x24   :  { %2187 = dma.done.wait [#allocation3], 2048  }
  0x25   :  { %2188 = vsyncadd [#allocation3], 4294965248 }
  0x26   :  { %2189 = dma.done.wait [#allocation6], 14336  }
  0x27   :  { %2190 = vsyncadd [#allocation6], 4294952960  ;;  %v2199_v0 = vmov 0.0|0.0   ;;  %vm2200_vm0 = vmmov 0   ;;  %v2201_v1 = vmov 0.0   ;;  %v319_v2 = vld [vmem:[#allocation2] sm:$0xff] }
  0x28   :  { %1906 = vmatprep.subr.bf16.mxu1 %v2199_v0  ;;  %1701 = vmatprep.mubr.msk.f32.mxu1 %vm2200_vm0, %v2201_v1  ;;  %v320_v3 = vld [vmem:[#allocation2 + $0x8] sm:$0xff]  ;;  %v321_v4 = vld [vmem:[#allocation2 + $0x10] sm:$0xff]  ;;  %v322_v6 = vld [vmem:[#allocation2 + $0x18] sm:$0xff]  ;;  %vm209_vm1 = vcmask 1043456   ;;  %vm184_vm2 = vcmask 31744   ;;  %vm797_vm3 = vcmask 1041409  }
  0x29   :  { %v1907_v5 = vpack.c.bf16 %v320_v3, %v319_v2  ;;  %v1910_v7 = vpack.c.bf16 %v322_v6, %v321_v4  ;;  %v323_v8 = vld [vmem:[#allocation2 + $0x20] sm:$0xff]  ;;  %v324_v9 = vld [vmem:[#allocation2 + $0x28] sm:$0xff]  ;;  %v171_v13 = vld [vmem:[%s2432_s0 + $0x10] sm:$0xff]  ;;  %vm799_vm4 = vcmask 1042434   ;;  %vm801_vm5 = vcmask 1043459  }
  0x2a   :  { %v177_v10 = vld [vmem:[%s2434_s2] sm:$0xf]  ;;  %v170_v12 = vld [vmem:[%s2432_s0 + $0x8] sm:$0xff]  ;;  %v1913_v14 = vpack.c.bf16 %v324_v9, %v323_v8  ;;  %v325_v15 = vld [vmem:[#allocation2 + $0x30] sm:$0xff]  ;;  %vm803_vm6 = vcmask 1044484   ;;  %vm805_vm7 = vcmask 1045509  }
  0x2b   :  { %1908 = vmatpush3.bf16.msra.mxu1 %v1907_v5  ;;  %1655 = vmatprep.subr.msk.mxu0 %vm209_vm1, %v177_v10  ;;  %v169_v11 = vld [vmem:[%s2432_s0] sm:$0xff]  ;;  %v326_v16 = vld [vmem:[#allocation2 + $0x38] sm:$0xff]  ;;  %v54_v22 = vld [vmem:[#allocation5 + $0x70] sm:$0xff]  ;;  %vm807_vm8 = vcmask 1046534   ;;  %vm809_vm9 = vcmask 1047559  }
  0x2c   :  { %1909 = vmatprep.subr.bf16.mxu1 %v2199_v0  ;;  %1656 = vmatpush3.msk.msra.mxu0 %vm209_vm1, %v177_v10  ;;  %v172_v17 = vld [vmem:[%s2432_s0 + $0x18] sm:$0xff]  ;;  %v52_v18 = vld [vmem:[#allocation5] sm:$0xff]  ;;  %v55_v23 = vld [vmem:[#allocation5 + $0xa8] sm:$0xff]  ;;  %v1916_v24 = vpack.c.bf16 %v326_v16, %v325_v15 }
  0x2d   :  { %1657 = vmatprep.mubr.msk.f32.mxu0 %vm184_vm2, %v169_v11  ;;  %v173_v19 = vld [vmem:[%s2432_s0 + $0x20] sm:$0xff]  ;;  %v53_v20 = vld [vmem:[#allocation5 + $0x38] sm:$0xff]  ;;  %v328_v26 = vld [vmem:[#allocation2 + $0x48] sm:$0xff]  ;;  %v1934_v29 = vpack.c.bf16 %v55_v23, %v54_v22 }
  0x2e   :  { %1658 = vmatmul.mubr.msk.f32.vlgmr.msra.gmra.mrb[0].mxu0 %vm184_vm2, %v170_v12  ;;  %v1930_v21 = vpack.c.bf16 %v53_v20, %v52_v18  ;;  %v327_v25 = vld [vmem:[#allocation2 + $0x40] sm:$0xff]  ;;  %v174_v27 = vld [vmem:[%s2432_s0 + $0x28] sm:$0xff]  ;;  %v175_v28 = vld [vmem:[%s2432_s0 + $0x30] sm:$0xff] }
  0x2f   :  { %1911 = vmatpush3.bf16.msra.mxu1 %v1910_v7  ;;  %1660 = vmatprep.mubr.msk.f32.mxu0 %vm184_vm2, %v171_v13  ;;  %v56_v30 = vld [vmem:[#allocation5 + $0xe0] sm:$0xff]  ;;  %v57_v31 = vld [vmem:[#allocation5 + $0x118] sm:$0xff]  ;;  %v1919_v32 = vpack.c.bf16 %v328_v26, %v327_v25  ;;  %v329_v33 = vld [vmem:[#allocation2 + $0x50] sm:$0xff] }
  0x30   :  { %1912 = vmatprep.subr.bf16.mxu1 %v2199_v0  ;;  %1931 = vmatprep.subr.bf16.mxu0 %v1930_v21  ;;  %v330_v34 = vld [vmem:[#allocation2 + $0x58] sm:$0xff]  ;;  %v1938_v36 = vpack.c.bf16 %v57_v31, %v56_v30  ;;  %v58_v37 = vld [vmem:[#allocation5 + $0x150] sm:$0xff]  ;;  %v59_v38 = vld [vmem:[#allocation5 + $0x188] sm:$0xff] }
  0x31   :  { %1933 = vmatpush3.bf16.msra.mxu0 %v1930_v21  ;;  %v176_v35 = vld [vmem:[%s2432_s0 + $0x38] sm:$0xff]  ;;  %v1922_v39 = vpack.c.bf16 %v330_v34, %v329_v33  ;;  %v331_v40 = vld [vmem:[#allocation2 + $0x60] sm:$0xff]  ;;  %v1942_v41 = vpack.c.bf16 %v59_v38, %v58_v37  ;;  %v332_v42 = vld [vmem:[#allocation2 + $0x68] sm:$0xff] }
  0x32   :  { %1661 = vmatmul.mubr.msk.f32.gmra.mrb[2].mxu0 %vm184_vm2, %v172_v17  ;;  %1935 = vmatprep.subr.bf16.mxu0 %v1934_v29  ;;  %v60_v43 = vld [vmem:[#allocation5 + $0x1c0] sm:$0xff]  ;;  %v61_v44 = vld [vmem:[#allocation5 + $0x1f8] sm:$0xff]  ;;  %v1925_v45 = vpack.c.bf16 %v332_v42, %v331_v40  ;;  %v333_v47 = vld [vmem:[#allocation2 + $0x70] sm:$0xff] }
  0x33   :  { %1914 = vmatpush3.bf16.msra.mxu1 %v1913_v14  ;;  %1663 = vmatprep.mubr.msk.f32.mxu0 %vm184_vm2, %v173_v19  ;;  %v1946_v46 = vpack.c.bf16 %v61_v44, %v60_v43  ;;  %v334_v48 = vld [vmem:[#allocation2 + $0x78] sm:$0xff]  ;;  %v318_v50 = vld [vmem:[%s2433_s1] sm:$0xff]  ;;  %v62_v51 = vld [vmem:[#allocation5 + $0x230] sm:$0xff] }
  0x34   :  { %1915 = vmatprep.subr.bf16.mxu1 %v2199_v0  ;;  %v1928_v49 = vpack.c.bf16 %v334_v48, %v333_v47  ;;  %v63_v52 = vld [vmem:[#allocation5 + $0x268] sm:$0xff]  ;;  %v64_v54 = vld [vmem:[#allocation5 + $0x2a0] sm:$0xff]  ;;  %v65_v55 = vld [vmem:[#allocation5 + $0x2d8] sm:$0xff] }
  0x35   :  { %1937 = vmatpush3.bf16.msra.mxu0 %v1934_v29  ;;  %v1950_v53 = vpack.c.bf16 %v63_v52, %v62_v51  ;;  %v1954_v56 = vpack.c.bf16 %v65_v55, %v64_v54  ;;  %v66_v57 = vld [vmem:[#allocation5 + $0x310] sm:$0xff]  ;;  %v67_v58 = vld [vmem:[#allocation5 + $0x348] sm:$0xff]  ;;  %v69_v61 = vld [vmem:[#allocation5 + $0x40] sm:$0xff]  ;;  %v410_v29 = vlaneseq }
  0x36   :  { %1664 = vmatmul.mubr.msk.f32.gmra.mrb[4].mxu0 %vm184_vm2, %v174_v27  ;;  %1939 = vmatprep.subr.bf16.mxu0 %v1938_v36  ;;  %v1958_v59 = vpack.c.bf16 %v67_v58, %v66_v57  ;;  %v68_v60 = vld [vmem:[#allocation5 + $0x8] sm:$0xff]  ;;  %v70_v62 = vld [vmem:[#allocation5 + $0x78] sm:$0xff]  ;;  %v71_v2 = vld [vmem:[#allocation5 + $0xb0] sm:$0xff]  ;;  %v2202_v27 = vmov 1966171168  }
  0x37   :  { %1917 = vmatpush3.bf16.msra.mxu1 %v1916_v24  ;;  %1666 = vmatprep.mubr.msk.f32.mxu0 %vm184_vm2, %v175_v28  ;;  %v1962_v63 = vpack.c.bf16 %v69_v61, %v68_v60  ;;  %v1966_v3 = vpack.c.bf16 %v71_v2, %v70_v62  ;;  %v72_v4 = vld [vmem:[#allocation5 + $0xe8] sm:$0xff]  ;;  %v73_v5 = vld [vmem:[#allocation5 + $0x120] sm:$0xff]  ;;  %v74_v7 = vld [vmem:[#allocation5 + $0x158] sm:$0xff]  ;;  %v408_v28 = vunpack.c.l.s4 %v2202_v27  ;;  %v2312_v31 = vshrl.u32 %v410_v29, 7 }
  0x38   :  { %1918 = vmatprep.subr.bf16.mxu1 %v2199_v0  ;;  %v1970_v6 = vpack.c.bf16 %v73_v5, %v72_v4  ;;  %v75_v8 = vld [vmem:[#allocation5 + $0x190] sm:$0xff]  ;;  %v76_v10 = vld [vmem:[#allocation5 + $0x1c8] sm:$0xff]  ;;  %v77_v11 = vld [vmem:[#allocation5 + $0x200] sm:$0xff] }
  0x39   :  { %1941 = vmatpush3.bf16.msra.mxu0 %v1938_v36  ;;  %v1974_v9 = vpack.c.bf16 %v75_v8, %v74_v7  ;;  %v1978_v12 = vpack.c.bf16 %v77_v11, %v76_v10  ;;  %v78_v13 = vld [vmem:[#allocation5 + $0x238] sm:$0xff]  ;;  %v79_v14 = vld [vmem:[#allocation5 + $0x270] sm:$0xff]  ;;  %v80_v16 = vld [vmem:[#allocation5 + $0x2a8] sm:$0xff]  ;;  %v409_v30 = vunpack.c.0.s8 %v408_v28  ;;  %v2322_v38 = vsub.s32 0, %v2312_v31 }
  0x3a   :  { %1667 = vmatmul.mubr.msk.f32.gmra.mrb[6].mxu0 %vm184_vm2, %v176_v35  ;;  %1943 = vmatprep.subr.bf16.mxu0 %v1942_v41  ;;  %v1982_v15 = vpack.c.bf16 %v79_v14, %v78_v13  ;;  %v81_v17 = vld [vmem:[#allocation5 + $0x2e0] sm:$0xff]  ;;  %v87_v27 = vld [vmem:[#allocation5 + $0xb8] sm:$0xff]  ;;  %v88_v29 = vld [vmem:[#allocation5 + $0xf0] sm:$0xff] }
  0x3b   :  { %1920 = vmatpush3.bf16.msra.mxu1 %v1919_v32  ;;  %v1986_v18 = vpack.c.bf16 %v81_v17, %v80_v16  ;;  %v2315_v32 = vsub.s32 %v409_v30, %v2312_v31  ;;  %v1510_v36 = vld [vmem:[%s2437_s5] ss:$0 sm:$0xff]  ;;  %v89_v30 = vld [vmem:[#allocation5 + $0x128] sm:$0xff] }
  0x3c   :  { %1921 = vmatprep.subr.bf16.mxu1 %v2199_v0 }
  0x3d   :  { %1945 = vmatpush3.bf16.msra.mxu0 %v1942_v41 }
  0x3e   :  { %1947 = vmatprep.subr.bf16.mxu0 %v1946_v46 }
  0x3f   :  { %1923 = vmatpush3.bf16.msra.mxu1 %v1922_v39 }
  0x40   :  { %1924 = vmatprep.subr.bf16.mxu1 %v2199_v0 }
  0x41   :  { %1949 = vmatpush3.bf16.msra.mxu0 %v1946_v46 }
  0x42   :  { %1951 = vmatprep.subr.bf16.mxu0 %v1950_v53 }
  0x43   :  { %1926 = vmatpush3.bf16.msra.mxu1 %v1925_v45 }
  0x44   :  { %1927 = vmatprep.subr.bf16.mxu1 %v2199_v0 }
  0x45   :  { %1953 = vmatpush3.bf16.msra.mxu0 %v1950_v53 }
  0x46   :  { %1955 = vmatprep.subr.bf16.mxu0 %v1954_v56 }
  0x47   :  { %1929 = vmatpush3.bf16.msra.mxu1 %v1928_v49 }
  0x48   :  { %1963 = vmatprep.subr.bf16.mxu1 %v1962_v63 }
  0x49   :  { %1957 = vmatpush3.bf16.msra.mxu0 %v1954_v56 }
  0x4a   :  { %1702 = vmatmul.mubr.f32.vlgmr.msra.gmra.mrb[0].mxu1 %v318_v50  ;;  %1959 = vmatprep.subr.bf16.mxu0 %v1958_v59 }
  0x4b   :  { %1965 = vmatpush3.bf16.msra.mxu1 %v1962_v63 }
  0x4c   :  { %1967 = vmatprep.subr.bf16.mxu1 %v1966_v3 }
  0x4d   :  { %1961 = vmatpush3.bf16.msra.mxu0 %v1958_v59 }
  0x4e   :  { %1994 = vmatprep.subr.bf16.mxu0 %v2199_v0 }
  0x4f   :  { %1969 = vmatpush3.bf16.msra.mxu1 %v1966_v3 }
  0x50   :  { %1971 = vmatprep.subr.bf16.mxu1 %v1970_v6 }
  0x53   :  { %1973 = vmatpush3.bf16.msra.mxu1 %v1970_v6 }
  0x54   :  { %1975 = vmatprep.subr.bf16.mxu1 %v1974_v9 }
  0x57   :  { %1977 = vmatpush3.bf16.msra.mxu1 %v1974_v9 }
  0x58   :  { %1979 = vmatprep.subr.bf16.mxu1 %v1978_v12 }
  0x5b   :  { %1981 = vmatpush3.bf16.msra.mxu1 %v1978_v12 }
  0x5c   :  { %1983 = vmatprep.subr.bf16.mxu1 %v1982_v15 }
  0x5f   :  { %1985 = vmatpush3.bf16.msra.mxu1 %v1982_v15 }
  0x60   :  { %1987 = vmatprep.subr.bf16.mxu1 %v1986_v18 }
  0x63   :  { %1989 = vmatpush3.bf16.msra.mxu1 %v1986_v18 }
 0x101   :  { %v1659_v19 = vpop.f32.mrb[0].mxu0 }
 0x102   :  { %v279_v20 = vpop.f32.mrb[1].mxu0  ;;  %v285_v42 = vadd.f32 %v1659_v19, %v1510_v36 }
 0x103   :  { %v280_v43 = vadd.f32 %v1510_v36, %v279_v20  ;;  %v84_v20 = vld [vmem:[#allocation5 + $0x10] sm:$0xff] }
 0x105   :  { %v1662_v21 = vpop.f32.mrb[2].mxu0 }
 0x106   :  { %v289_v22 = vpop.f32.mrb[3].mxu0  ;;  %v295_v44 = vadd.f32 %v1662_v21, %v1510_v36  ;;  %v85_v21 = vld [vmem:[#allocation5 + $0x48] sm:$0xff] }
 0x107   :  { %v290_v45 = vadd.f32 %v1510_v36, %v289_v22  ;;  %v1995_v22 = vpack.c.bf16 %v85_v21, %v84_v20 }
 0x109   :  { %v1665_v23 = vpop.f32.mrb[4].mxu0 }
 0x10a   :  { %v299_v24 = vpop.f32.mrb[5].mxu0  ;;  %v305_v51 = vadd.f32 %v1665_v23, %v1510_v36  ;;  %v82_v23 = vld [vmem:[#allocation5 + $0x318] sm:$0xff] }
 0x10b   :  { %v300_v52 = vadd.f32 %v1510_v36, %v299_v24  ;;  %v83_v24 = vld [vmem:[#allocation5 + $0x350] sm:$0xff] }
 0x10d   :  { %v1668_v25 = vpop.f32.mrb[6].mxu0 }
 0x10e   :  { %v309_v26 = vpop.f32.mrb[7].mxu0  ;;  %v315_v53 = vadd.f32 %v1668_v25, %v1510_v36  ;;  %v1990_v25 = vpack.c.bf16 %v83_v24, %v82_v23 }
 0x10f   :  { %v310_v60 = vadd.f32 %v1510_v36, %v309_v26  ;;  %v86_v26 = vld [vmem:[#allocation5 + $0x80] sm:$0xff] }
 0x110   :  { %1991 = vmatprep.subr.bf16.mxu1 %v1990_v25  ;;  %v1998_v28 = vpack.c.bf16 %v87_v27, %v86_v26 }
 0x111   :  { %1993 = vmatpush3.bf16.msra.mxu1 %v1990_v25 }
 0x11d   :  { %v401_v33 = vpop.f32.mrb[0].mxu1 }
 0x11e   :  { %v406_v34 = vcombine.high %v401_v33, %v401_v33  ;;  %v413_v35 = vrot.slane %v401_v33, %v2315_v32  ;;  %v1703_v37 = vpop.f32.mrb[1].mxu1  ;;  %v2001_v33 = vpack.c.bf16 %v89_v30, %v88_v29 }
 0x11f   :  { %v92_v37 = vld [vmem:[#allocation5 + $0x1d0] sm:$0xff] }
 0x120   :  { %v420_v39 = vrot.slane %v406_v34, %v2315_v32  ;;  %v421_v40 = vcombine.high %v413_v35, %v413_v35  ;;  %v429_v41 = vrot.slane %v413_v35, %v2315_v32  ;;  %v90_v34 = vld [vmem:[#allocation5 + $0x160] sm:$0xff]  ;;  %v91_v35 = vld [vmem:[#allocation5 + $0x198] sm:$0xff] }
 0x121   :  { %v2004_v36 = vpack.c.bf16 %v91_v35, %v90_v34 }
 0x122   :  { %v422_v46 = vcombine.high %v420_v39, %v420_v39  ;;  %v436_v47 = vrot.slane %v420_v39, %v2315_v32  ;;  %v443_v48 = vrot.slane %v421_v40, %v2315_v32  ;;  %v451_v49 = vcombine.high %v429_v41, %v429_v41  ;;  %v93_v39 = vld [vmem:[#allocation5 + $0x208] sm:$0xff] }
 0x123   :  { %v458_v50 = vrot.slane %v429_v41, %v2322_v38  ;;  %v2007_v40 = vpack.c.bf16 %v93_v39, %v92_v37  ;;  %v94_v41 = vld [vmem:[#allocation5 + $0x240] sm:$0xff] }
 0x124   :  { %v462_v54 = vrot.slane %v443_v48, %v2322_v38  ;;  %v453_v55 = vcombine.high %v443_v48, %v443_v48  ;;  %v466_v56 = vrot.slane %v451_v49, %v2322_v38  ;;  %v450_v57 = vrot.slane %v422_v46, %v2315_v32  ;;  %v99_v48 = vld [vmem:[#allocation5 + $0x358] sm:$0xff] }
 0x125   :  { %v495_v58 = vadd.f32 %v458_v50, %v280_v43  ;;  %v474_v59 = vrot.slane %v436_v47, %v2322_v38  ;;  %v452_v61 = vcombine.high %v436_v47, %v436_v47  ;;  %v98_v47 = vld [vmem:[#allocation5 + $0x320] sm:$0xff] }
 0x126   :  { %v496_v62 = vadd.f32 %v462_v54, %v285_v42  ;;  %v470_v63 = vrot.slane %v453_v55, %v2322_v38  ;;  %v497_v2 = vadd.f32 %v466_v56, %v290_v45  ;;  %v478_v3 = vrot.slane %v450_v57, %v2322_v38  ;;  %v95_v42 = vld [vmem:[#allocation5 + $0x278] sm:$0xff]  ;;  %v97_v45 = vld [vmem:[#allocation5 + $0x2e8] sm:$0xff]  ;;  %v1520_v50 = vld [vmem:[%s2437_s5 + $0x1] ss:$0 sm:$0xff] }
 0x127   :  { %v503_v4 = vmax.f32 %v495_v58, 0.0  ;;  %v499_v5 = vadd.f32 %v474_v59, %v300_v52  ;;  %v454_v6 = vcombine.high %v450_v57, %v450_v57  ;;  %v482_v7 = vrot.slane %v452_v61, %v2322_v38 }
 0x128   :  { %v504_v8 = vmax.f32 %v496_v62, 0.0  ;;  %v498_v9 = vadd.f32 %v470_v63, %v295_v44  ;;  %v505_v10 = vmax.f32 %v497_v2, 0.0  ;;  %v500_v11 = vadd.f32 %v478_v3, %v305_v51  ;;  %v96_v44 = vld [vmem:[#allocation5 + $0x2b0] sm:$0xff] }
 0x129   :  { %v486_v12 = vrot.slane %v454_v6, %v2322_v38  ;;  %v501_v13 = vadd.f32 %v482_v7, %v310_v60  ;;  %1736 = vmatprep.mubr.f32.mxu0 %v503_v4  ;;  %v507_v16 = vmax.f32 %v499_v5, 0.0  ;;  %v2010_v43 = vpack.c.bf16 %v95_v42, %v94_v41 }
 0x12a   :  { %1737 = vmatmul.mubr.f32.vlgmr.msra.gmra.mrb[8].mxu0 %v504_v8  ;;  %v506_v15 = vmax.f32 %v498_v9, 0.0  ;;  %v508_v17 = vmax.f32 %v500_v11, 0.0  ;;  %v2013_v46 = vpack.c.bf16 %v97_v45, %v96_v44  ;;  %v2016_v49 = vpack.c.bf16 %v99_v48, %v98_v47 }
 0x12b   :  { %v502_v14 = vadd.f32 %v486_v12, %v315_v53  ;;  %1739 = vmatprep.mubr.f32.mxu0 %v505_v10  ;;  %v509_v18 = vmax.f32 %v501_v13, 0.0  ;;  %1996 = vmatpush3.bf16.msra.mxu0 %v1995_v22 }
 0x12c   :  { %1997 = vmatprep.subr.bf16.mxu0 %v2199_v0 }
 0x12d   :  { %v510_v19 = vmax.f32 %v502_v14, 0.0 }
 0x12e   :  { %1740 = vmatmul.mubr.f32.gmra.mrb[10].mxu0 %v506_v15 }
 0x12f   :  { %1742 = vmatprep.mubr.f32.mxu0 %v507_v16  ;;  %1999 = vmatpush3.bf16.msra.mxu0 %v1998_v28 }
 0x130   :  { %2000 = vmatprep.subr.bf16.mxu0 %v2199_v0 }
 0x132   :  { %1743 = vmatmul.mubr.f32.gmra.mrb[12].mxu0 %v508_v17 }
 0x133   :  { %1745 = vmatprep.mubr.f32.mxu0 %v509_v18  ;;  %2002 = vmatpush3.bf16.msra.mxu0 %v2001_v33 }
 0x134   :  { %2003 = vmatprep.subr.bf16.mxu0 %v2199_v0 }
 0x136   :  { %1746 = vmatmul.mubr.f32.gmra.mrb[14].mxu0 %v510_v19 }
 0x137   :  { %1824 = vmatprep.mubr.msk.f32.mxu0 %vm2200_vm0, %v2201_v1  ;;  %2005 = vmatpush3.bf16.msra.mxu0 %v2004_v36 }
 0x138   :  { %2006 = vmatprep.subr.bf16.mxu0 %v2199_v0 }
 0x13b   :  { %2008 = vmatpush3.bf16.msra.mxu0 %v2007_v40 }
 0x13c   :  { %2009 = vmatprep.subr.bf16.mxu0 %v2199_v0 }
 0x13f   :  { %2011 = vmatpush3.bf16.msra.mxu0 %v2010_v43 }
 0x140   :  { %2012 = vmatprep.subr.bf16.mxu0 %v2199_v0 }
 0x143   :  { %2014 = vmatpush3.bf16.msra.mxu0 %v2013_v46 }
 0x144   :  { %2015 = vmatprep.subr.bf16.mxu0 %v2199_v0 }
 0x147   :  { %2017 = vmatpush3.bf16.msra.mxu0 %v2016_v49 }
 0x148   :  { %2050 = vmatprep.subr.bf16.mxu0 %v2199_v0 }
 0x1fd   :  { %v1738_v51 = vpop.f32.mrb[8].mxu0 }
 0x1fe   :  { %v589_v52 = vadd.f32 %v1738_v51, %v1520_v50  ;;  %v583_v53 = vpop.f32.mrb[9].mxu0 }
 0x1ff   :  { %v584_v54 = vadd.f32 %v1520_v50, %v583_v53 }
 0x200   :  { %v623_v55 = vmax.f32 %v589_v52, 0.0 }
 0x201   :  { %v622_v56 = vmax.f32 %v584_v54, 0.0  ;;  %v1741_v57 = vpop.f32.mrb[10].mxu0 }
 0x202   :  { %v636_v58 = vrot.slane %v623_v55, 4  ;;  %v599_v59 = vadd.f32 %v1741_v57, %v1520_v50  ;;  %v593_v60 = vpop.f32.mrb[11].mxu0 }
 0x203   :  { %v630_v61 = vrot.slane %v622_v56, 4  ;;  %v594_v62 = vadd.f32 %v1520_v50, %v593_v60  ;;  %1780 = vmatprep.mubr.f32.mxu1 %v622_v56 }
 0x204   :  { %v637_v63 = vmax.f32 %v623_v55, %v636_v58  ;;  %v625_v2 = vmax.f32 %v599_v59, 0.0  ;;  %1781 = vmatmul.mubr.f32.vlgmr.msra.gmra.mrb[2].mxu1 %v623_v55 }
 0x205   :  { %v631_v3 = vmax.f32 %v622_v56, %v630_v61  ;;  %v624_v4 = vmax.f32 %v594_v62, 0.0  ;;  %v1744_v5 = vpop.f32.mrb[12].mxu0 }
 0x206   :  { %v638_v6 = vrot.slane %v637_v63, 2  ;;  %v648_v7 = vrot.slane %v625_v2, 4  ;;  %v609_v8 = vadd.f32 %v1744_v5, %v1520_v50  ;;  %v603_v9 = vpop.f32.mrb[13].mxu0 }
 0x207   :  { %v632_v10 = vrot.slane %v631_v3, 2  ;;  %v642_v11 = vrot.slane %v624_v4, 4  ;;  %v604_v12 = vadd.f32 %v1520_v50, %v603_v9  ;;  %1783 = vmatprep.mubr.f32.mxu1 %v624_v4  ;;  %v100_v9 = vld [vmem:[#allocation5 + $0x18] sm:$0xff] }
 0x208   :  { %v639_v13 = vmax.f32 %v637_v63, %v638_v6  ;;  %v649_v14 = vmax.f32 %v625_v2, %v648_v7  ;;  %v627_v15 = vmax.f32 %v609_v8, 0.0  ;;  %1784 = vmatmul.mubr.f32.gmra.mrb[4].mxu1 %v625_v2 }
 0x209   :  { %v633_v16 = vmax.f32 %v631_v3, %v632_v10  ;;  %v643_v17 = vmax.f32 %v624_v4, %v642_v11  ;;  %v626_v18 = vmax.f32 %v604_v12, 0.0  ;;  %v1747_v19 = vpop.f32.mrb[14].mxu0  ;;  %v101_v10 = vld [vmem:[#allocation5 + $0x50] sm:$0xff]  ;;  %v102_v12 = vld [vmem:[#allocation5 + $0x88] sm:$0xff] }
 0x20a   :  { %v640_v20 = vrot.slane %v639_v13, 1  ;;  %v650_v21 = vrot.slane %v649_v14, 2  ;;  %v660_v22 = vrot.slane %v627_v15, 4  ;;  %v619_v23 = vadd.f32 %v1747_v19, %v1520_v50  ;;  %v613_v24 = vpop.f32.mrb[15].mxu0  ;;  %v107_v19 = vld [vmem:[#allocation5 + $0x1a0] sm:$0xff] }
 0x20b   :  { %v634_v25 = vrot.slane %v633_v16, 1  ;;  %v644_v26 = vrot.slane %v643_v17, 2  ;;  %v654_v27 = vrot.slane %v626_v18, 4  ;;  %v614_v28 = vadd.f32 %v1520_v50, %v613_v24  ;;  %1786 = vmatprep.mubr.f32.mxu1 %v626_v18  ;;  %v110_v24 = vld [vmem:[#allocation5 + $0x248] sm:$0xff] }
 0x20c   :  { %v641_v29 = vmax.f32 %v639_v13, %v640_v20  ;;  %v651_v30 = vmax.f32 %v649_v14, %v650_v21  ;;  %v661_v33 = vmax.f32 %v627_v15, %v660_v22  ;;  %v629_v34 = vmax.f32 %v619_v23, 0.0  ;;  %1787 = vmatmul.mubr.f32.gmra.mrb[6].mxu1 %v627_v15  ;;  %v103_v13 = vld [vmem:[#allocation5 + $0xc0] sm:$0xff]  ;;  %v104_v15 = vld [vmem:[#allocation5 + $0xf8] sm:$0xff]  ;;  %v109_v22 = vld [vmem:[#allocation5 + $0x210] sm:$0xff] }
 0x20d   :  { %v635_v35 = vmax.f32 %v633_v16, %v634_v25  ;;  %v645_v36 = vmax.f32 %v643_v17, %v644_v26  ;;  %v655_v37 = vmax.f32 %v626_v18, %v654_v27  ;;  %v628_v39 = vmax.f32 %v614_v28, 0.0  ;;  %v105_v16 = vld [vmem:[#allocation5 + $0x130] sm:$0xff]  ;;  %v106_v17 = vld [vmem:[#allocation5 + $0x168] sm:$0xff]  ;;  %v108_v21 = vld [vmem:[#allocation5 + $0x1d8] sm:$0xff] }
 0x20e   :  { %v652_v40 = vrot.slane %v651_v30, 1  ;;  %v662_v41 = vrot.slane %v661_v33, 2  ;;  %v672_v42 = vrot.slane %v629_v34, 4  ;;  %v2018_v11 = vpack.c.bf16 %v101_v10, %v100_v9  ;;  %v111_v25 = vld [vmem:[#allocation5 + $0x280] sm:$0xff]  ;;  %v117_v28 = vld [vmem:[#allocation5 + $0x58] sm:$0xff] }
 0x20f   :  { %v798_v43 = vsel %vm797_vm3, %v641_v29, %v635_v35  ;;  %v646_v44 = vrot.slane %v645_v36, 1  ;;  %v656_v45 = vrot.slane %v655_v37, 2  ;;  %v666_v46 = vrot.slane %v628_v39, 4  ;;  %1789 = vmatprep.mubr.f32.mxu1 %v628_v39  ;;  %v116_v26 = vld [vmem:[#allocation5 + $0x20] sm:$0xff] }
 0x210   :  { %v663_v47 = vmax.f32 %v661_v33, %v662_v41  ;;  %v673_v48 = vmax.f32 %v629_v34, %v672_v42  ;;  %1790 = vmatmul.mubr.f32.gmra.mrb[8].mxu1 %v629_v34  ;;  %v653_v52 = vmax.f32 %v651_v30, %v652_v40  ;;  %2019 = vmatprep.subr.bf16.mxu1 %v2018_v11  ;;  %v112_v30 = vld [vmem:[#allocation5 + $0x2b8] sm:$0xff]  ;;  %v113_v33 = vld [vmem:[#allocation5 + $0x2f0] sm:$0xff]  ;;  %v115_v40 = vld [vmem:[#allocation5 + $0x360] sm:$0xff] }
 0x211   :  { %v647_v49 = vmax.f32 %v645_v36, %v646_v44  ;;  %v657_v50 = vmax.f32 %v655_v37, %v656_v45  ;;  %v667_v51 = vmax.f32 %v628_v39, %v666_v46  ;;  %2021 = vmatpush3.bf16.msra.mxu1 %v2018_v11  ;;  %v2022_v14 = vpack.c.bf16 %v103_v13, %v102_v12  ;;  %v118_v34 = vld [vmem:[#allocation5 + $0x90] sm:$0xff]  ;;  %v119_v36 = vld [vmem:[#allocation5 + $0xc8] sm:$0xff]  ;;  %v120_v41 = vld [vmem:[#allocation5 + $0x100] sm:$0xff] }
 0x212   :  { %v664_v53 = vrot.slane %v663_v47, 1  ;;  %v674_v54 = vrot.slane %v673_v48, 2  ;;  %v2026_v18 = vpack.c.bf16 %v105_v16, %v104_v15  ;;  %v2030_v20 = vpack.c.bf16 %v107_v19, %v106_v17  ;;  %v114_v39 = vld [vmem:[#allocation5 + $0x328] sm:$0xff]  ;;  %v122_v45 = vld [vmem:[#allocation5 + $0x170] sm:$0xff] }
 0x213   :  { %v800_v55 = vsel %vm799_vm4, %v647_v49, %v798_v43  ;;  %v658_v56 = vrot.slane %v657_v50, 1  ;;  %v668_v57 = vrot.slane %v667_v51, 2  ;;  %2023 = vmatprep.subr.bf16.mxu1 %v2022_v14  ;;  %v2034_v23 = vpack.c.bf16 %v109_v22, %v108_v21  ;;  %v121_v43 = vld [vmem:[#allocation5 + $0x138] sm:$0xff]  ;;  %v123_v46 = vld [vmem:[#allocation5 + $0x1a8] sm:$0xff] }
 0x214   :  { %v675_v58 = vmax.f32 %v673_v48, %v674_v54  ;;  %v802_v59 = vsel %vm801_vm5, %v653_v52, %v800_v55  ;;  %v665_v62 = vmax.f32 %v663_v47, %v664_v53  ;;  %v2038_v27 = vpack.c.bf16 %v111_v25, %v110_v24  ;;  %v124_v48 = vld [vmem:[#allocation5 + $0x1e0] sm:$0xff]  ;;  %v125_v49 = vld [vmem:[#allocation5 + $0x218] sm:$0xff]  ;;  %v127_v52 = vld [vmem:[#allocation5 + $0x288] sm:$0xff] }
 0x215   :  { %v659_v60 = vmax.f32 %v657_v50, %v658_v56  ;;  %v669_v61 = vmax.f32 %v667_v51, %v668_v57  ;;  %2025 = vmatpush3.bf16.msra.mxu1 %v2022_v14  ;;  %v2051_v29 = vpack.c.bf16 %v117_v28, %v116_v26  ;;  %v2042_v35 = vpack.c.bf16 %v113_v33, %v112_v30  ;;  %v126_v51 = vld [vmem:[#allocation5 + $0x250] sm:$0xff]  ;;  %v128_v54 = vld [vmem:[#allocation5 + $0x2c0] sm:$0xff]  ;;  %v129_v55 = vld [vmem:[#allocation5 + $0x2f8] sm:$0xff] }
 0x216   :  { %v676_v63 = vrot.slane %v675_v58, 1  ;;  %2027 = vmatprep.subr.bf16.mxu1 %v2026_v18  ;;  %v2054_v37 = vpack.c.bf16 %v119_v36, %v118_v34  ;;  %v2046_v42 = vpack.c.bf16 %v115_v40, %v114_v39  ;;  %v2057_v44 = vpack.c.bf16 %v121_v43, %v120_v41  ;;  %v130_v57 = vld [vmem:[#allocation5 + $0x330] sm:$0xff] }
 0x217   :  { %v670_v2 = vrot.slane %v669_v61, 1  ;;  %v804_v3 = vsel %vm803_vm6, %v659_v60, %v802_v59  ;;  %v2060_v47 = vpack.c.bf16 %v123_v46, %v122_v45  ;;  %v2063_v50 = vpack.c.bf16 %v125_v49, %v124_v48 }
 0x218   :  { %v806_v4 = vsel %vm805_vm7, %v665_v62, %v804_v3  ;;  %v677_v6 = vmax.f32 %v675_v58, %v676_v63  ;;  %v2066_v53 = vpack.c.bf16 %v127_v52, %v126_v51  ;;  %v2069_v56 = vpack.c.bf16 %v129_v55, %v128_v54  ;;  %v131_v58 = vld [vmem:[#allocation5 + $0x368] sm:$0xff] }
 0x219   :  { %v671_v5 = vmax.f32 %v669_v61, %v670_v2  ;;  %2029 = vmatpush3.bf16.msra.mxu1 %v2026_v18  ;;  %v2072_v59 = vpack.c.bf16 %v131_v58, %v130_v57 }
 0x21a   :  { %2031 = vmatprep.subr.bf16.mxu1 %v2030_v20 }
 0x21b   :  { %v808_v7 = vsel %vm807_vm8, %v671_v5, %v806_v4 }
 0x21c   :  { %v810_v8 = vsel %vm809_vm9, %v677_v6, %v808_v7  ;;  %v1521_v6 = vld [vmem:[%s2437_s5 + $0x2] ss:$0 sm:$0xff] }
 0x21d   :  { %1825 = vmatmul.mubr.f32.vlgmr.msra.gmra.mrb[16].mxu0 %v810_v8  ;;  %2033 = vmatpush3.bf16.msra.mxu1 %v2030_v20 }
 0x21e   :  { %1903 = vmatprep.mubr.msk.f32.mxu0 %vm2200_vm0, %v2201_v1  ;;  %2035 = vmatprep.subr.bf16.mxu1 %v2034_v23 }
 0x21f   :  { %2052 = vmatpush3.bf16.msra.mxu0 %v2051_v29 }
 0x220   :  { %2053 = vmatprep.subr.bf16.mxu0 %v2199_v0 }
 0x221   :  { %2037 = vmatpush3.bf16.msra.mxu1 %v2034_v23 }
 0x222   :  { %2039 = vmatprep.subr.bf16.mxu1 %v2038_v27 }
 0x223   :  { %2055 = vmatpush3.bf16.msra.mxu0 %v2054_v37 }
 0x224   :  { %2056 = vmatprep.subr.bf16.mxu0 %v2199_v0 }
 0x225   :  { %2041 = vmatpush3.bf16.msra.mxu1 %v2038_v27 }
 0x226   :  { %2043 = vmatprep.subr.bf16.mxu1 %v2042_v35 }
 0x227   :  { %2058 = vmatpush3.bf16.msra.mxu0 %v2057_v44 }
 0x228   :  { %2059 = vmatprep.subr.bf16.mxu0 %v2199_v0 }
 0x229   :  { %2045 = vmatpush3.bf16.msra.mxu1 %v2042_v35 }
 0x22a   :  { %2047 = vmatprep.subr.bf16.mxu1 %v2046_v42 }
 0x22b   :  { %2061 = vmatpush3.bf16.msra.mxu0 %v2060_v47 }
 0x22c   :  { %2062 = vmatprep.subr.bf16.mxu0 %v2199_v0 }
 0x22d   :  { %2049 = vmatpush3.bf16.msra.mxu1 %v2046_v42 }
 0x22f   :  { %2064 = vmatpush3.bf16.msra.mxu0 %v2063_v50 }
 0x230   :  { %2065 = vmatprep.subr.bf16.mxu0 %v2199_v0 }
 0x233   :  { %2067 = vmatpush3.bf16.msra.mxu0 %v2066_v53 }
 0x234   :  { %2068 = vmatprep.subr.bf16.mxu0 %v2199_v0 }
 0x237   :  { %2070 = vmatpush3.bf16.msra.mxu0 %v2069_v56 }
 0x238   :  { %2071 = vmatprep.subr.bf16.mxu0 %v2199_v0 }
 0x23b   :  { %2073 = vmatpush3.bf16.msra.mxu0 %v2072_v59 }
 0x2d7   :  { %v1782_v60 = vpop.f32.mrb[2].mxu1 }
 0x2d8   :  { %v744_v61 = vpop.f32.mrb[3].mxu1 }
 0x2db   :  { %v1785_v62 = vpop.f32.mrb[4].mxu1 }
 0x2dc   :  { %v754_v63 = vpop.f32.mrb[5].mxu1 }
 0x2df   :  { %v1788_v2 = vpop.f32.mrb[6].mxu1 }
 0x2e0   :  { %v764_v3 = vpop.f32.mrb[7].mxu1 }
 0x2e3   :  { %v1791_v4 = vpop.f32.mrb[8].mxu1 }
 0x2e4   :  { %v774_v5 = vpop.f32.mrb[9].mxu1 }
 0x2f0   :  { %v878_v7 = vpop.f32.mrb[16].mxu0 }
 0x2f1   :  { %v879_v8 = vadd.f32 %v1521_v6, %v878_v7  ;;  %v1826_v9 = vpop.f32.mrb[17].mxu0 }
 0x2f3   :  { %v883_v10 = vcombine.high %v879_v8, %v879_v8  ;;  %v890_v11 = vrot.slane %v879_v8, %v2315_v32 }
 0x2f5   :  { %v897_v0 = vrot.slane %v883_v10, %v2315_v32  ;;  %v898_v12 = vcombine.high %v890_v11, %v890_v11  ;;  %v906_v13 = vrot.slane %v890_v11, %v2315_v32 }
 0x2f7   :  { %v899_v14 = vcombine.high %v897_v0, %v897_v0  ;;  %v913_v15 = vrot.slane %v897_v0, %v2315_v32  ;;  %v920_v16 = vrot.slane %v898_v12, %v2315_v32  ;;  %v928_v17 = vcombine.high %v906_v13, %v906_v13 }
 0x2f8   :  { %v935_v18 = vrot.slane %v906_v13, %v2322_v38 }
 0x2f9   :  { %v939_v19 = vrot.slane %v920_v16, %v2322_v38  ;;  %v943_v20 = vrot.slane %v928_v17, %v2322_v38  ;;  %v930_v21 = vcombine.high %v920_v16, %v920_v16  ;;  %v951_v22 = vrot.slane %v913_v15, %v2322_v38 }
 0x2fa   :  { %v972_v23 = vadd.f32 %v935_v18, %v744_v61  ;;  %v927_v24 = vrot.slane %v899_v14, %v2315_v32  ;;  %v929_v25 = vcombine.high %v913_v15, %v913_v15 }
 0x2fb   :  { %v973_v26 = vadd.f32 %v1782_v60, %v939_v19  ;;  %v974_v27 = vadd.f32 %v943_v20, %v754_v63  ;;  %v947_v28 = vrot.slane %v930_v21, %v2322_v38  ;;  %v976_v29 = vadd.f32 %v951_v22, %v764_v3 }
 0x2fc   :  { %v980_v30 = vmax.f32 %v972_v23, 0.0  ;;  %v955_v33 = vrot.slane %v927_v24, %v2322_v38  ;;  %v959_v34 = vrot.slane %v929_v25, %v2322_v38  ;;  %v931_v35 = vcombine.high %v927_v24, %v927_v24 }
 0x2fd   :  { %v981_v36 = vmax.f32 %v973_v26, 0.0  ;;  %v982_v37 = vmax.f32 %v974_v27, 0.0  ;;  %v975_v39 = vadd.f32 %v1785_v62, %v947_v28  ;;  %v984_v40 = vmax.f32 %v976_v29, 0.0 }
 0x2fe   :  { %v988_v41 = vrot.slane %v980_v30, 4  ;;  %1859 = vmatprep.mubr.f32.mxu1 %v980_v30  ;;  %v977_v42 = vadd.f32 %v1788_v2, %v955_v33  ;;  %v978_v43 = vadd.f32 %v959_v34, %v774_v5  ;;  %v963_v44 = vrot.slane %v931_v35, %v2322_v38 }
 0x2ff   :  { %v994_v45 = vrot.slane %v981_v36, 4  ;;  %1860 = vmatmul.mubr.f32.vlgmr.msra.gmra.mrb[10].mxu1 %v981_v36  ;;  %v1000_v46 = vrot.slane %v982_v37, 4  ;;  %v983_v47 = vmax.f32 %v975_v39, 0.0  ;;  %v1012_v48 = vrot.slane %v984_v40, 4 }
 0x300   :  { %v989_v49 = vmax.f32 %v980_v30, %v988_v41  ;;  %1862 = vmatprep.mubr.f32.mxu1 %v982_v37  ;;  %v985_v50 = vmax.f32 %v977_v42, 0.0  ;;  %v986_v51 = vmax.f32 %v978_v43, 0.0  ;;  %v979_v52 = vadd.f32 %v1791_v4, %v963_v44  ;;  %v133_v44 = vld [vmem:[#allocation5 + $0x30] sm:$0xff] }
 0x301   :  { %v995_v53 = vmax.f32 %v981_v36, %v994_v45  ;;  %v1001_v54 = vmax.f32 %v982_v37, %v1000_v46  ;;  %v1006_v55 = vrot.slane %v983_v47, 4  ;;  %v1013_v56 = vmax.f32 %v984_v40, %v1012_v48  ;;  %v135_v45 = vld [vmem:[#allocation5 + $0x68] sm:$0xff]  ;;  %v134_v48 = vld [vmem:[#allocation5 + $0x60] sm:$0xff] }
 0x302   :  { %v990_v57 = vrot.slane %v989_v49, 2  ;;  %v1018_v58 = vrot.slane %v985_v50, 4  ;;  %v1024_v59 = vrot.slane %v986_v51, 4  ;;  %v987_v60 = vmax.f32 %v979_v52, 0.0  ;;  %v136_v52 = vld [vmem:[#allocation5 + $0x98] sm:$0xff] }
 0x303   :  { %v996_v61 = vrot.slane %v995_v53, 2  ;;  %v1002_v62 = vrot.slane %v1001_v54, 2  ;;  %v1007_v63 = vmax.f32 %v983_v47, %v1006_v55  ;;  %1863 = vmatmul.mubr.f32.gmra.mrb[12].mxu1 %v983_v47  ;;  %v1014_v2 = vrot.slane %v1013_v56, 2  ;;  %v132_v47 = vld [vmem:[#allocation5 + $0x28] sm:$0xff]  ;;  %v141_v55 = vld [vmem:[#allocation5 + $0x110] sm:$0xff] }
 0x304   :  { %v991_v3 = vmax.f32 %v989_v49, %v990_v57  ;;  %1865 = vmatprep.mubr.f32.mxu1 %v984_v40  ;;  %v1019_v5 = vmax.f32 %v985_v50, %v1018_v58  ;;  %v1025_v6 = vmax.f32 %v986_v51, %v1024_v59  ;;  %v1030_v7 = vrot.slane %v987_v60, 4  ;;  %v137_v49 = vld [vmem:[#allocation5 + $0xa0] sm:$0xff]  ;;  %v140_v58 = vld [vmem:[#allocation5 + $0x108] sm:$0xff] }
 0x305   :  { %v997_v8 = vmax.f32 %v995_v53, %v996_v61  ;;  %v1003_v4 = vmax.f32 %v1001_v54, %v1002_v62  ;;  %v1008_v9 = vrot.slane %v1007_v63, 2  ;;  %v1015_v10 = vmax.f32 %v1013_v56, %v1014_v2  ;;  %v138_v53 = vld [vmem:[#allocation5 + $0xd0] sm:$0xff]  ;;  %v143_v56 = vld [vmem:[#allocation5 + $0x148] sm:$0xff]  ;;  %v142_v59 = vld [vmem:[#allocation5 + $0x140] sm:$0xff] }
 0x306   :  { %v992_v11 = vrot.slane %v991_v3, 1  ;;  %v1020_v0 = vrot.slane %v1019_v5, 2  ;;  %v1026_v12 = vrot.slane %v1025_v6, 2  ;;  %v1031_v13 = vmax.f32 %v987_v60, %v1030_v7  ;;  %v145_v61 = vld [vmem:[#allocation5 + $0x180] sm:$0xff]  ;;  %v147_v62 = vld [vmem:[#allocation5 + $0x1b8] sm:$0xff]  ;;  %v151_v7 = vld [vmem:[#allocation5 + $0x228] sm:$0xff] }
 0x307   :  { %v998_v14 = vrot.slane %v997_v8, 1  ;;  %v1004_v15 = vrot.slane %v1003_v4, 1  ;;  %v1009_v16 = vmax.f32 %v1007_v63, %v1008_v9  ;;  %1866 = vmatmul.mubr.f32.gmra.mrb[14].mxu1 %v985_v50  ;;  %v1016_v17 = vrot.slane %v1015_v10, 1  ;;  %v139_v50 = vld [vmem:[#allocation5 + $0xd8] sm:$0xff]  ;;  %v150_v9 = vld [vmem:[#allocation5 + $0x220] sm:$0xff] }
 0x308   :  { %v1021_v18 = vmax.f32 %v1019_v5, %v1020_v0  ;;  %v1027_v19 = vmax.f32 %v1025_v6, %v1026_v12  ;;  %1868 = vmatprep.mubr.f32.mxu1 %v986_v51  ;;  %v1032_v20 = vrot.slane %v1031_v13, 2  ;;  %v993_v22 = vmax.f32 %v991_v3, %v992_v11  ;;  %v144_v2 = vld [vmem:[#allocation5 + $0x178] sm:$0xff]  ;;  %v146_v3 = vld [vmem:[#allocation5 + $0x1b0] sm:$0xff]  ;;  %v153_v11 = vld [vmem:[#allocation5 + $0x260] sm:$0xff] }
 0x309   :  { %v999_v21 = vmax.f32 %v997_v8, %v998_v14  ;;  %v1005_v23 = vmax.f32 %v1003_v4, %v1004_v15  ;;  %v1010_v24 = vrot.slane %v1009_v16, 1  ;;  %v1017_v30 = vmax.f32 %v1015_v10, %v1016_v17  ;;  %v149_v6 = vld [vmem:[#allocation5 + $0x1f0] sm:$0xff]  ;;  %v148_v4 = vld [vmem:[#allocation5 + $0x1e8] sm:$0xff]  ;;  %v155_v0 = vld [vmem:[#allocation5 + $0x298] sm:$0xff] }
 0x30a   :  { %v1022_v25 = vrot.slane %v1021_v18, 1  ;;  %v1028_v26 = vrot.slane %v1027_v19, 1  ;;  %v1033_v27 = vmax.f32 %v1031_v13, %v1032_v20  ;;  %v2074_v46 = vpack.c.bf16 %v135_v45, %v133_v44  ;;  %v152_v13 = vld [vmem:[#allocation5 + $0x258] sm:$0xff]  ;;  %v154_v14 = vld [vmem:[#allocation5 + $0x290] sm:$0xff]  ;;  %v159_v17 = vld [vmem:[#allocation5 + $0x308] sm:$0xff] }
 0x30b   :  { %v1011_v28 = vmax.f32 %v1009_v16, %v1010_v24  ;;  %1869 = vmatmul.mubr.f32.gmra.mrb[16].mxu1 %v987_v60  ;;  %v1155_v29 = vsel %vm797_vm3, %v999_v21, %v993_v22  ;;  %v2078_v51 = vpack.c.bf16 %v139_v50, %v137_v49  ;;  %v2080_v54 = vpack.c.bf16 %v138_v53, %v136_v52  ;;  %v157_v16 = vld [vmem:[#allocation5 + $0x2d0] sm:$0xff]  ;;  %v158_v20 = vld [vmem:[#allocation5 + $0x300] sm:$0xff]  ;;  %v160_v24 = vld [vmem:[#allocation5 + $0x338] sm:$0xff] }
 0x30c   :  { %v1034_v33 = vrot.slane %v1033_v27, 1  ;;  %v1156_v34 = vsel %vm799_vm4, %v1005_v23, %v1155_v29  ;;  %1470 = vmatprep.mubr.f32.mxu1 %v2201_v1  ;;  %v1023_v35 = vmax.f32 %v1021_v18, %v1022_v25  ;;  %v1029_v37 = vmax.f32 %v1027_v19, %v1028_v26  ;;  %2075 = vmatprep.subr.bf16.mxu1 %v2074_v46  ;;  %v156_v19 = vld [vmem:[#allocation5 + $0x2c8] sm:$0xff]  ;;  %v161_v22 = vld [vmem:[#allocation5 + $0x340] sm:$0xff]  ;;  %v163_v23 = vld [vmem:[#allocation5 + $0x378] sm:$0xff] }
 0x30d   :  { %v1157_v36 = vsel %vm801_vm5, %v1011_v28, %v1156_v34  ;;  %v2076_v1 = vpack.c.bf16 %v134_v48, %v132_v47  ;;  %v2082_v57 = vpack.c.bf16 %v143_v56, %v141_v55  ;;  %v2084_v60 = vpack.c.bf16 %v142_v59, %v140_v58  ;;  %v162_v26 = vld [vmem:[#allocation5 + $0x370] sm:$0xff] }
 0x30e   :  { %v1158_v39 = vsel %vm803_vm6, %v1017_v30, %v1157_v36  ;;  %v1035_v40 = vmax.f32 %v1033_v27, %v1034_v33  ;;  %v2086_v63 = vpack.c.bf16 %v147_v62, %v145_v61  ;;  %v2088_v5 = vpack.c.bf16 %v146_v3, %v144_v2 }
 0x30f   :  { %v1159_v41 = vsel %vm805_vm7, %v1023_v35, %v1158_v39  ;;  %2077 = vmatpush1.bf16.msra.mxu1 %v2076_v1  ;;  %v2090_v8 = vpack.c.bf16 %v151_v7, %v149_v6  ;;  %v2092_v10 = vpack.c.bf16 %v150_v9, %v148_v4  ;;  %v2094_v12 = vpack.c.bf16 %v155_v0, %v153_v11  ;;  %v1522_v39 = vld [vmem:[%s2437_s5 + $0x3] ss:$0 sm:$0xff] }
 0x310   :  { %v1160_v42 = vsel %vm807_vm8, %v1029_v37, %v1159_v41  ;;  %2079 = vmatprep.subr.bf16.mxu1 %v2078_v51  ;;  %v2096_v15 = vpack.c.bf16 %v154_v14, %v152_v13  ;;  %v2098_v18 = vpack.c.bf16 %v159_v17, %v157_v16  ;;  %v2100_v21 = vpack.c.bf16 %v158_v20, %v156_v19 }
 0x311   :  { %v1161_v43 = vsel %vm809_vm9, %v1035_v40, %v1160_v42  ;;  %v2102_v25 = vpack.c.bf16 %v163_v23, %v161_v22  ;;  %v2104_v27 = vpack.c.bf16 %v162_v26, %v160_v24 }
 0x312   :  { %1904 = vmatmul.mubr.f32.vlgmr.msra.gmra.mrb[18].mxu0 %v1161_v43 }
 0x313   :  { %2081 = vmatpush1.bf16.msra.mxu1 %v2080_v54 }
 0x314   :  { %2083 = vmatprep.subr.bf16.mxu1 %v2082_v57 }
 0x317   :  { %2085 = vmatpush1.bf16.msra.mxu1 %v2084_v60 }
 0x318   :  { %2087 = vmatprep.subr.bf16.mxu1 %v2086_v63 }
 0x31b   :  { %2089 = vmatpush1.bf16.msra.mxu1 %v2088_v5 }
 0x31c   :  { %2091 = vmatprep.subr.bf16.mxu1 %v2090_v8 }
 0x31f   :  { %2093 = vmatpush1.bf16.msra.mxu1 %v2092_v10 }
 0x320   :  { %2095 = vmatprep.subr.bf16.mxu1 %v2094_v12 }
 0x323   :  { %2097 = vmatpush1.bf16.msra.mxu1 %v2096_v15 }
 0x324   :  { %2099 = vmatprep.subr.bf16.mxu1 %v2098_v18 }
 0x327   :  { %2101 = vmatpush1.bf16.msra.mxu1 %v2100_v21 }
 0x328   :  { %2103 = vmatprep.subr.bf16.mxu1 %v2102_v25 }
 0x32b   :  { %2105 = vmatpush1.bf16.msra.mxu1 %v2104_v27 }
 0x3d2   :  { %v1861_v28 = vpop.f32.mrb[10].mxu1 }
 0x3d3   :  { %v1102_v29 = vpop.f32.mrb[11].mxu1 }
 0x3d6   :  { %v1864_v30 = vpop.f32.mrb[12].mxu1 }
 0x3d7   :  { %v1112_v33 = vpop.f32.mrb[13].mxu1 }
 0x3da   :  { %v1867_v34 = vpop.f32.mrb[14].mxu1 }
 0x3db   :  { %v1122_v35 = vpop.f32.mrb[15].mxu1 }
 0x3de   :  { %v1870_v36 = vpop.f32.mrb[16].mxu1 }
 0x3df   :  { %v1132_v37 = vpop.f32.mrb[17].mxu1 }
 0x3e5   :  { %v1229_v40 = vpop.f32.mrb[18].mxu0 }
 0x3e6   :  { %v1230_v41 = vadd.f32 %v1522_v39, %v1229_v40  ;;  %v1905_v42 = vpop.f32.mrb[19].mxu0 }
 0x3e8   :  { %v1234_v43 = vcombine.high %v1230_v41, %v1230_v41  ;;  %v1241_v44 = vrot.slane %v1230_v41, %v2315_v32 }
 0x3ea   :  { %v1248_v45 = vrot.slane %v1234_v43, %v2315_v32  ;;  %v1249_v46 = vcombine.high %v1241_v44, %v1241_v44  ;;  %v1257_v47 = vrot.slane %v1241_v44, %v2315_v32 }
 0x3ec   :  { %v1250_v48 = vcombine.high %v1248_v45, %v1248_v45  ;;  %v1264_v1 = vrot.slane %v1248_v45, %v2315_v32  ;;  %v1271_v49 = vrot.slane %v1249_v46, %v2315_v32  ;;  %v1279_v50 = vcombine.high %v1257_v47, %v1257_v47 }
 0x3ed   :  { %v1286_v51 = vrot.slane %v1257_v47, %v2322_v38 }
 0x3ee   :  { %v1278_v52 = vrot.slane %v1250_v48, %v2315_v32  ;;  %v1280_v53 = vcombine.high %v1264_v1, %v1264_v1  ;;  %v1281_v54 = vcombine.high %v1271_v49, %v1271_v49  ;;  %v1290_v55 = vrot.slane %v1271_v49, %v2322_v38 }
 0x3ef   :  { %v1294_v56 = vrot.slane %v1279_v50, %v2322_v38  ;;  %v1302_v57 = vrot.slane %v1264_v1, %v2322_v38  ;;  %v1323_v58 = vadd.f32 %v1286_v51, %v1102_v29 }
 0x3f0   :  { %v1282_v59 = vcombine.high %v1278_v52, %v1278_v52  ;;  %v1298_v60 = vrot.slane %v1281_v54, %v2322_v38  ;;  %v1306_v61 = vrot.slane %v1278_v52, %v2322_v38  ;;  %v1310_v62 = vrot.slane %v1280_v53, %v2322_v38 }
 0x3f1   :  { %v1324_v63 = vadd.f32 %v1861_v28, %v1290_v55  ;;  %v1325_v2 = vadd.f32 %v1294_v56, %v1112_v33  ;;  %v1327_v3 = vadd.f32 %v1302_v57, %v1122_v35  ;;  %v1331_v32 = vrot.slane %v1323_v58, 4 }
 0x3f2   :  { %v1314_v5 = vrot.slane %v1282_v59, %v2322_v38  ;;  %v1326_v6 = vadd.f32 %v1864_v30, %v1298_v60  ;;  %v1328_v7 = vadd.f32 %v1867_v34, %v1306_v61  ;;  %v1329_v8 = vadd.f32 %v1310_v62, %v1132_v37 }
 0x3f3   :  { %v1332_v4 = vmax.f32 %v1323_v58, %v1331_v32  ;;  %v1337_v9 = vrot.slane %v1324_v63, 4  ;;  %v1343_v10 = vrot.slane %v1325_v2, 4  ;;  %v1355_v11 = vrot.slane %v1327_v3, 4 }
 0x3f4   :  { %v1330_v0 = vadd.f32 %v1870_v36, %v1314_v5  ;;  %v1349_v12 = vrot.slane %v1326_v6, 4  ;;  %v1361_v13 = vrot.slane %v1328_v7, 4  ;;  %v1367_v14 = vrot.slane %v1329_v8, 4 }
 0x3f5   :  { %v1333_v15 = vrot.slane %v1332_v4, 2  ;;  %v1338_v16 = vmax.f32 %v1324_v63, %v1337_v9  ;;  %v1344_v17 = vmax.f32 %v1325_v2, %v1343_v10  ;;  %v1356_v18 = vmax.f32 %v1327_v3, %v1355_v11  ;;  %v168_v2 = vld [vmem:[%s2437_s5 + $0x4] sm:$0x3]  ;;  %s2203_s5 = smov [#allocation7]  }
 0x3f6   :  { %v1350_v19 = vmax.f32 %v1326_v6, %v1349_v12  ;;  %v1362_v20 = vmax.f32 %v1328_v7, %v1361_v13  ;;  %v1368_v21 = vmax.f32 %v1329_v8, %v1367_v14  ;;  %v1373_v22 = vrot.slane %v1330_v0, 4  ;;  %s1500_s24 = sshll.u32 %s2203_s5, 4  ;;  %s1501_s24 = int_to_ptr.vmem [resolvable:$true] %s1500_s24 }
 0x3f7   :  { %v1334_v23 = vmax.f32 %v1332_v4, %v1333_v15  ;;  %v1339_v24 = vrot.slane %v1338_v16, 2  ;;  %v1345_v25 = vrot.slane %v1344_v17, 2  ;;  %v1357_v26 = vrot.slane %v1356_v18, 2  ;;  %s2165_s25 = scalar_lea.vmem %s1501_s24, 256  ;;  %p2170_p3 = scmp.lt.s32.totalorder %s1501_s24, %s1501_s24 }
 0x3f8   :  { %v1351_v27 = vrot.slane %v1350_v19, 2  ;;  %v1363_v28 = vrot.slane %v1362_v20, 2  ;;  %v1369_v29 = vrot.slane %v1368_v21, 2  ;;  %v1374_v30 = vmax.f32 %v1330_v0, %v1373_v22  ;;  %p2166_p2 = scmp.ne.s32.totalorder %s1501_s24, %s2165_s25  ;;  %p2171_p4 = scmp.lt.s32.totalorder %s2165_s25, %s2165_s25 }
 0x3f9   :  { %v1335_v33 = vrot.slane %v1334_v23, 1  ;;  %v1340_v34 = vmax.f32 %v1338_v16, %v1339_v24  ;;  %v1346_v35 = vmax.f32 %v1344_v17, %v1345_v25  ;;  %v1358_v36 = vmax.f32 %v1356_v18, %v1357_v26 }
 0x3fa   :  { %v1352_v37 = vmax.f32 %v1350_v19, %v1351_v27  ;;  %v1364_v39 = vmax.f32 %v1362_v20, %v1363_v28  ;;  %v1370_v40 = vmax.f32 %v1368_v21, %v1369_v29  ;;  %v1375_v41 = vrot.slane %v1374_v30, 2  ;;  %p2172_p5 = por %p2171_p4, %p2170_p3 }
 0x3fb   :  { %v1341_v42 = vrot.slane %v1340_v34, 1  ;;  %v1347_v43 = vrot.slane %v1346_v35, 1  ;;  %v1359_v45 = vrot.slane %v1358_v36, 1  ;;  %v1336_v47 = vmax.f32 %v1334_v23, %v1335_v33 }
 0x3fc   :  { %v1353_v44 = vrot.slane %v1352_v37, 1  ;;  %v1376_v46 = vmax.f32 %v1374_v30, %v1375_v41  ;;  %v1365_v49 = vrot.slane %v1364_v39, 1  ;;  %v1371_v51 = vrot.slane %v1370_v40, 1  ;;  %p2173_p6 = pnand %p2172_p5, %p2166_p2 }
 0x3fd   :  { %v1342_v48 = vmax.f32 %v1340_v34, %v1341_v42  ;;  %v1348_v1 = vmax.f32 %v1346_v35, %v1347_v43  ;;  %v1360_v54 = vmax.f32 %v1358_v36, %v1359_v45  ;;  %v1386_v3 = vsub.s32 1, %v2312_v31 }
 0x3fe   :  { %v1354_v50 = vmax.f32 %v1352_v37, %v1353_v44  ;;  %v1377_v53 = vrot.slane %v1376_v46, 1  ;;  %v1366_v56 = vmax.f32 %v1364_v39, %v1365_v49  ;;  %v1372_v58 = vmax.f32 %v1370_v40, %v1371_v51 }
 0x3ff   :  { %v1398_v52 = vsel %vm797_vm3, %v1342_v48, %v1336_v47  ;;  %v1383_v32 = vrot.slane %v168_v2, %v2322_v38  ;;  %v1387_v5 = vrot.slane %v168_v2, %v1386_v3 }
 0x400   :  { %v1399_v55 = vsel %vm799_vm4, %v1348_v1, %v1398_v52  ;;  %v1378_v60 = vmax.f32 %v1376_v46, %v1377_v53 }
 0x401   :  { %v1400_v57 = vsel %vm801_vm5, %v1354_v50, %v1399_v55 }
 0x402   :  { %v1401_v59 = vsel %vm803_vm6, %v1360_v54, %v1400_v57 }
 0x403   :  { %v1402_v61 = vsel %vm805_vm7, %v1366_v56, %v1401_v59 }
 0x404   :  { %v1403_v62 = vsel %vm807_vm8, %v1372_v58, %v1402_v61 }
 0x405   :  { %v1404_v63 = vsel %vm809_vm9, %v1378_v60, %v1403_v62 }
 0x406   :  { %1471 = vmatmul.mubr.f32.vlgmr.msra.gmra.mrb[18].mxu1 %v1404_v63 }
 0x4d9   :  { %v1472_v6 = vpop.f32.mrb[18].mxu1 }
 0x4da   :  { %v1473_v7 = vadd.f32 %v1472_v6, %v1383_v32  ;;  %v1474_v8 = vpop.f32.mrb[19].mxu1 }
 0x4db   :  { %v1475_v4 = vadd.f32 %v1474_v8, %v1387_v5 }
 0x4dc   :  { %1492 = vst [vmem:[#allocation7] sm:$0xff] %v1473_v7 }
 0x4dd   :  { %v1478_v9 = vand.u32 2147483647, %v1475_v4  ;;  %v1477_v38 = vmax.f32 %v1475_v4, 0.0 }
 0x4df   :  { %v1479_v10 = vsub.f32 0.0, %v1478_v9 }
 0x4e1   :  { %v1480_v11 = vmul.f32 1.442695, %v1479_v10 }
 0x4e3   :  { %2117 = vpow2.f32 %v1480_v11 }
 0x4ed   :  { %v2118_v0 = vpop.eup %2117 }
 0x4ee   :  { %v1482_v12 = vadd.f32 1.0, %v2118_v0  ;;  %v1485_v13 = vmul.f32 -0.5, %v2118_v0  ;;  %v1488_v15 = vand.u32 2147483647, %v2118_v0 }
 0x4f0   :  { %2119 = vlog2.f32 %v1482_v12  ;;  %v1486_v14 = vadd.f32 1.0, %v1485_v13  ;;  %vm1489_vm10 = vcmp.lt.f32.partialorder %v1488_v15, 0.0004427343 }
 0x4f2   :  { %v1487_v17 = vmul.f32 %v2118_v0, %v1486_v14 }
 0x4fa   :  { %v2120_v16 = vpop.eup %2119 }
 0x4fb   :  { %v1484_v31 = vmul.f32 0.6931472, %v2120_v16 }
 0x4fd   :  { %v1490_v18 = vsel %vm1489_vm10, %v1487_v17, %v1484_v31 }
 0x4fe   :  { %v1491_v19 = vadd.f32 %v1490_v18, %v1477_v38 }
 0x500   :  { %1493 = vst [vmem:[#allocation7 + $0x8] sm:$0xff] %v1491_v19 }
 0x501   :  { %2176 = shalt.err (!%p2173_p6)
}
 0x502   :  { %s2177_s28 = scalar_lea.hbm %s2438_s6, 256 }
 0x503   :  { %p2178_p7 = scmp.ne.s32.totalorder %s2438_s6, %s2177_s28  ;;  %p2181_p8 = scmp.lt.u32.totalorder %s2177_s28, %s2438_s6 }
 0x505   :  { %p2183_p9 = pnand %p2181_p8, %p2178_p7 }
 0x507   :  { %2186 = shalt.err (!%p2183_p9)
}
 0x508   :  { %1503 = dma.vmem_to_hbm [thread:$0]  %s1501_s24, 256, %s2438_s6, [#allocation4]  }
 0x509   :  { %2191 = dma.done.wait [#allocation4], 256  }
 0x50a   :  { %2192 = vsyncadd [#allocation4], 4294967040 }
 0x50b   :  { %1507 = vsyncpa [#allocation3], 1 }
 0x50c   :  { %1508 = vsyncpa [#allocation6], 1 }
 0x50d   :  { %1509 = vsyncpa [#allocation4], 1 }

</bundles_post_ra>
